<compile_context>
chip_gen: v7x
topology: tpu7x:2x2x1
jax: 0.10.0
libtpu: 0.0.40
codegen_flags: <defaults>
</compile_context>

<pallas_src>
import functools

import jax
import jax.numpy as jnp
from jax.experimental import pallas as pl
from jax.experimental.pallas import tpu as pltpu

_LEAKY_SLOPE = 0.01  # torch.nn.LeakyReLU default negative_slope
_N_LAYERS = 6
_VMEM_FIT_BUDGET = 48 * 1024 * 1024  # conservative vs v7x's 64 MiB per TC


def _round_up(n, m):
    return ((n + m - 1) // m) * m


def _layer_dims(input_dim, output_dim):
    return (input_dim, input_dim + 20, input_dim + 10, input_dim,
            input_dim // 2, input_dim // 4, output_dim)


def _mlp_kernel(x_ref, w1_ref, w2_ref, w3_ref, w4_ref, w5_ref, w6_ref,
                b_ref, o_ref):
    """One batch tile through all 6 layers. b_ref[i] = bias of layer i+1 (lane padded)."""
    w_refs = (w1_ref, w2_ref, w3_ref, w4_ref, w5_ref, w6_ref)
    h = x_ref[...]
    for i, w_ref in enumerate(w_refs):
        width = w_ref.shape[1]  # static, multiple of 128
        h = jnp.dot(h.astype(w_ref.dtype), w_ref[...],
                    preferred_element_type=jnp.float32)
        h = h + b_ref[i:i + 1, :width]          # (1, width) f32 bias add
        if i < _N_LAYERS - 1:
            h = jnp.maximum(h, _LEAKY_SLOPE * h)  # LeakyReLU, 2 VALU ops
    o_ref[...] = h.astype(o_ref.dtype)


def pack_params(params, input_dim, output_dim, compute_dtype=jnp.bfloat16):
    """One-time parameter prep.

    Every layer *output* width is zero-padded to a multiple of 128 (lane-dense
    loads/stores); layer-1 input width stays natural (x is fed unpadded).  The
    six biases are packed into a single (8, bmax) f32 table.  Zero padding is
    mathematically exact (LeakyReLU(0)=0, padded weight rows/cols are zero).
    """
    dims = _layer_dims(input_dim, output_dim)
    out_pdims = tuple(_round_up(max(d, 1), 128) for d in dims[1:])
    in_pdims = (input_dim,) + out_pdims[:-1]

    ws = []
    for i in range(_N_LAYERS):
        w = jnp.asarray(params[f"w{i + 1}"], jnp.float32)  # (in_feat, out_feat)
        wp = jnp.zeros((in_pdims[i], out_pdims[i]), compute_dtype)
        wp = wp.at[:dims[i], :dims[i + 1]].set(w.astype(compute_dtype))
        ws.append(wp)

    bmax = max(out_pdims)
    bp = jnp.zeros((8, bmax), jnp.float32)  # 6 used rows, padded to 8 sublanes
    for i in range(_N_LAYERS):
        bp = bp.at[i, :dims[i + 1]].set(
            jnp.asarray(params[f"b{i + 1}"], jnp.float32))

    return {"ws": tuple(ws), "b_pack": bp, "dims": dims,
            "in_pdims": in_pdims, "out_pdims": out_pdims}


def model_regv4_lr_forward(x, packed, *, tile_b=1024, weight_buffers=1):
    """x: (B, input_dim). packed: output of pack_params. Call under jax.jit so
    the small pad / final slice fuse with the surrounding program."""
    dims, in_pdims, out_pdims = packed["dims"], packed["in_pdims"], packed["out_pdims"]
    B, D = x.shape
    assert D == dims[0], f"expected input_dim={dims[0]}, got {D}"

    out_pad = out_pdims[-1]
    x_itemsize = jnp.dtype(x.dtype).itemsize
    w_itemsize = jnp.dtype(packed["ws"][0].dtype).itemsize
    w_bytes = sum(a * b for a, b in zip(in_pdims, out_pdims)) * w_itemsize
    b_bytes = packed["b_pack"].size * 4
    w_buf = 1 if weight_buffers == 1 else 2

    # --- batch tiling: pad only to the sublane granule, never to a full tile.
    B_pad = _round_up(max(B, 8), 8)
    TB = min(_round_up(tile_b, 8), B_pad)
    if B_pad >= 16:                                   # >= 2 grid steps -> megacore (v7x)
        TB = min(TB, _round_up(pl.cdiv(B_pad, 2), 8))
    TB = _round_up(pl.cdiv(B_pad, pl.cdiv(B_pad, TB)), 8)   # balance ragged remainder

    def vmem_estimate(tb):
        act = 2 * tb * D * x_itemsize + 2 * tb * out_pad * 4  # double-buffered x / out
        tmp = 3 * tb * max(out_pdims) * 4                     # live f32 intermediates
        return w_buf * w_bytes + 2 * b_bytes + act + tmp

    while vmem_estimate(TB) > _VMEM_FIT_BUDGET and TB > 8:
        TB = max(8, _round_up(TB // 2, 8))

    grid = (pl.cdiv(B_pad, TB),)

    if B_pad != B:  # tiny: at most 7 rows of zeros
        x = jnp.pad(x, ((0, B_pad - B), (0, 0)))

    resident = ({} if weight_buffers is None
                else dict(pipeline_mode=pl.Buffered(weight_buffers)))
    x_spec = pl.BlockSpec((TB, D), lambda i: (i, 0))
    w_specs = [pl.BlockSpec(w.shape, lambda i: (0, 0), **resident)
               for w in packed["ws"]]
    b_spec = pl.BlockSpec(packed["b_pack"].shape, lambda i: (0, 0), **resident)
    out_spec = pl.BlockSpec((TB, out_pad), lambda i: (i, 0))

    flops = 2 * B_pad * sum(a * b for a, b in zip(in_pdims, out_pdims))
    bytes_accessed = (B_pad * D * x_itemsize + B_pad * out_pad * 4
                      + w_bytes + b_bytes)
    vmem_limit = int(min(max(vmem_estimate(TB) * 1.25, 32 * 1024 * 1024),
                         64 * 1024 * 1024))

    out_p = pl.pallas_call(
        _mlp_kernel,
        out_shape=jax.ShapeDtypeStruct((B_pad, out_pad), jnp.float32),
        grid=grid,
        in_specs=[x_spec, *w_specs, b_spec],
        out_specs=out_spec,
        compiler_params=pltpu.CompilerParams(
            dimension_semantics=("parallel",),
            vmem_limit_bytes=vmem_limit),
        cost_estimate=pl.CostEstimate(flops=flops, transcendentals=0,
                                      bytes_accessed=bytes_accessed),
    )(x, *packed["ws"], packed["b_pack"])

    # Sliced inside the caller's jit so it fuses with the consumer.
    return out_p[:B, :dims[-1]]


def init_params(key, input_dim, output_dim):
    """Deterministic init mimicking torch.nn.Linear default U[-1/sqrt(fan_in), +].
    Weights stored as (in_features, out_features) so y = x @ W + b."""
    dims = _layer_dims(input_dim, output_dim)
    params = {}
    keys = jax.random.split(key, 2 * _N_LAYERS)
    for i in range(_N_LAYERS):
        fan_in, fan_out = dims[i], dims[i + 1]
        bound = 1.0 / (fan_in ** 0.5)
        params[f"w{i + 1}"] = jax.random.uniform(
            keys[2 * i], (fan_in, fan_out), minval=-bound, maxval=bound,
            dtype=jnp.float32)
        params[f"b{i + 1}"] = jax.random.uniform(
            keys[2 * i + 1], (fan_out,), minval=-bound, maxval=bound,
            dtype=jnp.float32)
    return params


def _reference_forward(x, params):
    """Pure-JAX reference of ModelRegv4_lr.forward (eval mode)."""
    h = x
    for i in range(_N_LAYERS):
        h = h @ params[f"w{i + 1}"] + params[f"b{i + 1}"]
        if i < _N_LAYERS - 1:
            h = jnp.where(h > 0, h, _LEAKY_SLOPE * h)
    return h


if __name__ == "__main__":
    input_dim = 16
    output_dim = 4
    batch = 8

    key = jax.random.PRNGKey(0)
    k_x, k_p = jax.random.split(key)
    x = jax.random.normal(k_x, (batch, input_dim), dtype=jnp.float32)
    params = init_params(k_p, input_dim, output_dim)
    ref = _reference_forward(x, params)

    packed_f32 = pack_params(params, input_dim, output_dim,
                             compute_dtype=jnp.float32)   # strict-parity path
    packed_bf16 = pack_params(params, input_dim, output_dim)  # default bf16 path

    def run(packed, weight_buffers):
        fwd = jax.jit(functools.partial(model_regv4_lr_forward, packed=packed,
                                        weight_buffers=weight_buffers))
        return jax.block_until_ready(fwd(x))

    # Single-buffered resident weights; fall back to default buffering if this
    # jax/Mosaic version does not accept pipeline_mode=pl.Buffered(1).
    weight_buffers = 1
    try:
        out_f32 = run(packed_f32, weight_buffers)
    except Exception:
        weight_buffers = None
        out_f32 = run(packed_f32, weight_buffers)

    assert out_f32.shape == (batch, output_dim)
    assert jnp.allclose(out_f32, ref, atol=1e-5, rtol=1e-5), "f32 mismatch vs reference"

    # bf16 weight path (MXU-native on v6e/v7x): looser tolerance expected.
    out_bf16 = run(packed_bf16, weight_buffers)
    assert out_bf16.shape == (batch, output_dim)
    assert jnp.allclose(out_bf16, ref, atol=5e-2, rtol=5e-2), "bf16 mismatch vs reference"

    print("KERNEL_OK")
</pallas_src>

<mosaic_0001>
module attributes {stable_mosaic.version = 11 : i64} {
  func.func @_mlp_kernel(%arg0: i32, %arg1: memref<8x16xf32, #tpu.memory_space<vmem>>, %arg2: memref<16x128xf32, #tpu.memory_space<vmem>>, %arg3: memref<128x128xf32, #tpu.memory_space<vmem>>, %arg4: memref<128x128xf32, #tpu.memory_space<vmem>>, %arg5: memref<128x128xf32, #tpu.memory_space<vmem>>, %arg6: memref<128x128xf32, #tpu.memory_space<vmem>>, %arg7: memref<128x128xf32, #tpu.memory_space<vmem>>, %arg8: memref<8x128xf32, #tpu.memory_space<vmem>>, %arg9: memref<8x128xf32, #tpu.memory_space<vmem>>) attributes {dimension_semantics = [#tpu.dimension_semantics<parallel>], iteration_bounds = array<i64: 1>, scalar_prefetch = 0 : i64, scratch_operands = 0 : i64, tpu.core_type = #tpu.core_type<tc>, window_params = [{transform_indices = @transform_0, window_bounds = array<i64: 8, 16>}, {pipeline_mode = #tpu.pipeline_mode<synchronous>, transform_indices = @transform_1, window_bounds = array<i64: 16, 128>}, {pipeline_mode = #tpu.pipeline_mode<synchronous>, transform_indices = @transform_2, window_bounds = array<i64: 128, 128>}, {pipeline_mode = #tpu.pipeline_mode<synchronous>, transform_indices = @transform_3, window_bounds = array<i64: 128, 128>}, {pipeline_mode = #tpu.pipeline_mode<synchronous>, transform_indices = @transform_4, window_bounds = array<i64: 128, 128>}, {pipeline_mode = #tpu.pipeline_mode<synchronous>, transform_indices = @transform_5, window_bounds = array<i64: 128, 128>}, {pipeline_mode = #tpu.pipeline_mode<synchronous>, transform_indices = @transform_6, window_bounds = array<i64: 128, 128>}, {pipeline_mode = #tpu.pipeline_mode<synchronous>, transform_indices = @transform_7, window_bounds = array<i64: 8, 128>}, {transform_indices = @transform_8, window_bounds = array<i64: 8, 128>}]} {
    %c0 = arith.constant 0 : index
    %c0_0 = arith.constant 0 : index
    %0 = vector.load %arg1[%c0, %c0_0] : memref<8x16xf32, #tpu.memory_space<vmem>>, vector<8x16xf32>
    %c0_1 = arith.constant 0 : index
    %c0_2 = arith.constant 0 : index
    %1 = vector.load %arg2[%c0_1, %c0_2] : memref<16x128xf32, #tpu.memory_space<vmem>>, vector<16x128xf32>
    %cst = arith.constant dense<0.000000e+00> : vector<8x128xf32>
    %2 = tpu.matmul %0, %1, %cst {dimension_numbers = #tpu.dot_dimension_numbers<[1], [0], [0], [1], [0, 0, 1, 1], [], []>} : vector<8x16xf32>, vector<16x128xf32>, vector<8x128xf32> -> vector<8x128xf32>
    %c0_3 = arith.constant 0 : index
    %c0_4 = arith.constant 0 : index
    %3 = vector.load %arg8[%c0_3, %c0_4] : memref<8x128xf32, #tpu.memory_space<vmem>>, vector<1x128xf32>
    %4 = vector.broadcast %3 : vector<1x128xf32> to vector<8x128xf32>
    %5 = arith.addf %2, %4 : vector<8x128xf32>
    %cst_5 = arith.constant 0.00999999977 : f32
    %6 = vector.broadcast %cst_5 : f32 to vector<8x128xf32>
    %7 = arith.mulf %6, %5 : vector<8x128xf32>
    %8 = arith.maximumf %5, %7 : vector<8x128xf32>
    %c0_6 = arith.constant 0 : index
    %c0_7 = arith.constant 0 : index
    %9 = vector.load %arg3[%c0_6, %c0_7] : memref<128x128xf32, #tpu.memory_space<vmem>>, vector<128x128xf32>
    %cst_8 = arith.constant dense<0.000000e+00> : vector<8x128xf32>
    %10 = tpu.matmul %8, %9, %cst_8 {dimension_numbers = #tpu.dot_dimension_numbers<[1], [0], [0], [1], [0, 0, 1, 1], [], []>} : vector<8x128xf32>, vector<128x128xf32>, vector<8x128xf32> -> vector<8x128xf32>
    %c1 = arith.constant 1 : index
    %c0_9 = arith.constant 0 : index
    %11 = vector.load %arg8[%c1, %c0_9] : memref<8x128xf32, #tpu.memory_space<vmem>>, vector<1x128xf32>
    %12 = vector.broadcast %11 : vector<1x128xf32> to vector<8x128xf32>
    %13 = arith.addf %10, %12 : vector<8x128xf32>
    %cst_10 = arith.constant 0.00999999977 : f32
    %14 = vector.broadcast %cst_10 : f32 to vector<8x128xf32>
    %15 = arith.mulf %14, %13 : vector<8x128xf32>
    %16 = arith.maximumf %13, %15 : vector<8x128xf32>
    %c0_11 = arith.constant 0 : index
    %c0_12 = arith.constant 0 : index
    %17 = vector.load %arg4[%c0_11, %c0_12] : memref<128x128xf32, #tpu.memory_space<vmem>>, vector<128x128xf32>
    %cst_13 = arith.constant dense<0.000000e+00> : vector<8x128xf32>
    %18 = tpu.matmul %16, %17, %cst_13 {dimension_numbers = #tpu.dot_dimension_numbers<[1], [0], [0], [1], [0, 0, 1, 1], [], []>} : vector<8x128xf32>, vector<128x128xf32>, vector<8x128xf32> -> vector<8x128xf32>
    %c2 = arith.constant 2 : index
    %c0_14 = arith.constant 0 : index
    %19 = vector.load %arg8[%c2, %c0_14] : memref<8x128xf32, #tpu.memory_space<vmem>>, vector<1x128xf32>
    %20 = vector.broadcast %19 : vector<1x128xf32> to vector<8x128xf32>
    %21 = arith.addf %18, %20 : vector<8x128xf32>
    %cst_15 = arith.constant 0.00999999977 : f32
    %22 = vector.broadcast %cst_15 : f32 to vector<8x128xf32>
    %23 = arith.mulf %22, %21 : vector<8x128xf32>
    %24 = arith.maximumf %21, %23 : vector<8x128xf32>
    %c0_16 = arith.constant 0 : index
    %c0_17 = arith.constant 0 : index
    %25 = vector.load %arg5[%c0_16, %c0_17] : memref<128x128xf32, #tpu.memory_space<vmem>>, vector<128x128xf32>
    %cst_18 = arith.constant dense<0.000000e+00> : vector<8x128xf32>
    %26 = tpu.matmul %24, %25, %cst_18 {dimension_numbers = #tpu.dot_dimension_numbers<[1], [0], [0], [1], [0, 0, 1, 1], [], []>} : vector<8x128xf32>, vector<128x128xf32>, vector<8x128xf32> -> vector<8x128xf32>
    %c3 = arith.constant 3 : index
    %c0_19 = arith.constant 0 : index
    %27 = vector.load %arg8[%c3, %c0_19] : memref<8x128xf32, #tpu.memory_space<vmem>>, vector<1x128xf32>
    %28 = vector.broadcast %27 : vector<1x128xf32> to vector<8x128xf32>
    %29 = arith.addf %26, %28 : vector<8x128xf32>
    %cst_20 = arith.constant 0.00999999977 : f32
    %30 = vector.broadcast %cst_20 : f32 to vector<8x128xf32>
    %31 = arith.mulf %30, %29 : vector<8x128xf32>
    %32 = arith.maximumf %29, %31 : vector<8x128xf32>
    %c0_21 = arith.constant 0 : index
    %c0_22 = arith.constant 0 : index
    %33 = vector.load %arg6[%c0_21, %c0_22] : memref<128x128xf32, #tpu.memory_space<vmem>>, vector<128x128xf32>
    %cst_23 = arith.constant dense<0.000000e+00> : vector<8x128xf32>
    %34 = tpu.matmul %32, %33, %cst_23 {dimension_numbers = #tpu.dot_dimension_numbers<[1], [0], [0], [1], [0, 0, 1, 1], [], []>} : vector<8x128xf32>, vector<128x128xf32>, vector<8x128xf32> -> vector<8x128xf32>
    %c4 = arith.constant 4 : index
    %c0_24 = arith.constant 0 : index
    %35 = vector.load %arg8[%c4, %c0_24] : memref<8x128xf32, #tpu.memory_space<vmem>>, vector<1x128xf32>
    %36 = vector.broadcast %35 : vector<1x128xf32> to vector<8x128xf32>
    %37 = arith.addf %34, %36 : vector<8x128xf32>
    %cst_25 = arith.constant 0.00999999977 : f32
    %38 = vector.broadcast %cst_25 : f32 to vector<8x128xf32>
    %39 = arith.mulf %38, %37 : vector<8x128xf32>
    %40 = arith.maximumf %37, %39 : vector<8x128xf32>
    %c0_26 = arith.constant 0 : index
    %c0_27 = arith.constant 0 : index
    %41 = vector.load %arg7[%c0_26, %c0_27] : memref<128x128xf32, #tpu.memory_space<vmem>>, vector<128x128xf32>
    %cst_28 = arith.constant dense<0.000000e+00> : vector<8x128xf32>
    %42 = tpu.matmul %40, %41, %cst_28 {dimension_numbers = #tpu.dot_dimension_numbers<[1], [0], [0], [1], [0, 0, 1, 1], [], []>} : vector<8x128xf32>, vector<128x128xf32>, vector<8x128xf32> -> vector<8x128xf32>
    %c5 = arith.constant 5 : index
    %c0_29 = arith.constant 0 : index
    %43 = vector.load %arg8[%c5, %c0_29] : memref<8x128xf32, #tpu.memory_space<vmem>>, vector<1x128xf32>
    %44 = vector.broadcast %43 : vector<1x128xf32> to vector<8x128xf32>
    %45 = arith.addf %42, %44 : vector<8x128xf32>
    %c0_30 = arith.constant 0 : index
    %c0_31 = arith.constant 0 : index
    %46 = vector.load %arg9[%c0_30, %c0_31] : memref<8x128xf32, #tpu.memory_space<vmem>>, vector<8x128xf32>
    tpu.vector_store %arg9[%c0_30, %c0_31], %45 {strides = array<i32>} : memref<8x128xf32, #tpu.memory_space<vmem>>, vector<8x128xf32>,
    return
  }
  func.func @transform_0(%arg0: i32) -> (i32, i32) {
    %c0_i32 = arith.constant 0 : i32
    %c0_i32_0 = arith.constant 0 : i32
    return %arg0, %c0_i32 : i32, i32
  }
  func.func @transform_1(%arg0: i32) -> (i32, i32) {
    %c0_i32 = arith.constant 0 : i32
    %c0_i32_0 = arith.constant 0 : i32
    %c0_i32_1 = arith.constant 0 : i32
    return %c0_i32, %c0_i32_0 : i32, i32
  }
  func.func @transform_2(%arg0: i32) -> (i32, i32) {
    %c0_i32 = arith.constant 0 : i32
    %c0_i32_0 = arith.constant 0 : i32
    %c0_i32_1 = arith.constant 0 : i32
    return %c0_i32, %c0_i32_0 : i32, i32
  }
  func.func @transform_3(%arg0: i32) -> (i32, i32) {
    %c0_i32 = arith.constant 0 : i32
    %c0_i32_0 = arith.constant 0 : i32
    %c0_i32_1 = arith.constant 0 : i32
    return %c0_i32, %c0_i32_0 : i32, i32
  }
  func.func @transform_4(%arg0: i32) -> (i32, i32) {
    %c0_i32 = arith.constant 0 : i32
    %c0_i32_0 = arith.constant 0 : i32
    %c0_i32_1 = arith.constant 0 : i32
    return %c0_i32, %c0_i32_0 : i32, i32
  }
  func.func @transform_5(%arg0: i32) -> (i32, i32) {
    %c0_i32 = arith.constant 0 : i32
    %c0_i32_0 = arith.constant 0 : i32
    %c0_i32_1 = arith.constant 0 : i32
    return %c0_i32, %c0_i32_0 : i32, i32
  }
  func.func @transform_6(%arg0: i32) -> (i32, i32) {
    %c0_i32 = arith.constant 0 : i32
    %c0_i32_0 = arith.constant 0 : i32
    %c0_i32_1 = arith.constant 0 : i32
    return %c0_i32, %c0_i32_0 : i32, i32
  }
  func.func @transform_7(%arg0: i32) -> (i32, i32) {
    %c0_i32 = arith.constant 0 : i32
    %c0_i32_0 = arith.constant 0 : i32
    %c0_i32_1 = arith.constant 0 : i32
    return %c0_i32, %c0_i32_0 : i32, i32
  }
  func.func @transform_8(%arg0: i32) -> (i32, i32) {
    %c0_i32 = arith.constant 0 : i32
    %c0_i32_0 = arith.constant 0 : i32
    return %arg0, %c0_i32 : i32, i32
  }
}

module attributes {stable_mosaic.version = 11 : i64} {
  func.func @_mlp_kernel(%arg0: i32, %arg1: memref<8x16xf32, #tpu.memory_space<vmem>>, %arg2: memref<16x128xf32, #tpu.memory_space<vmem>>, %arg3: memref<128x128xf32, #tpu.memory_space<vmem>>, %arg4: memref<128x128xf32, #tpu.memory_space<vmem>>, %arg5: memref<128x128xf32, #tpu.memory_space<vmem>>, %arg6: memref<128x128xf32, #tpu.memory_space<vmem>>, %arg7: memref<128x128xf32, #tpu.memory_space<vmem>>, %arg8: memref<8x128xf32, #tpu.memory_space<vmem>>, %arg9: memref<8x128xf32, #tpu.memory_space<vmem>>) attributes {dimension_semantics = [#tpu.dimension_semantics<parallel>], iteration_bounds = array<i64: 1>, scalar_prefetch = 0 : i64, scratch_operands = 0 : i64, tpu.core_type = #tpu.core_type<tc>, window_params = [{transform_indices = @transform_0, window_bounds = array<i64: 8, 16>}, {pipeline_mode = #tpu.pipeline_mode<synchronous>, transform_indices = @transform_1, window_bounds = array<i64: 16, 128>}, {pipeline_mode = #tpu.pipeline_mode<synchronous>, transform_indices = @transform_2, window_bounds = array<i64: 128, 128>}, {pipeline_mode = #tpu.pipeline_mode<synchronous>, transform_indices = @transform_3, window_bounds = array<i64: 128, 128>}, {pipeline_mode = #tpu.pipeline_mode<synchronous>, transform_indices = @transform_4, window_bounds = array<i64: 128, 128>}, {pipeline_mode = #tpu.pipeline_mode<synchronous>, transform_indices = @transform_5, window_bounds = array<i64: 128, 128>}, {pipeline_mode = #tpu.pipeline_mode<synchronous>, transform_indices = @transform_6, window_bounds = array<i64: 128, 128>}, {pipeline_mode = #tpu.pipeline_mode<synchronous>, transform_indices = @transform_7, window_bounds = array<i64: 8, 128>}, {transform_indices = @transform_8, window_bounds = array<i64: 8, 128>}]} {
    %c0 = arith.constant 0 : index
    %c0_0 = arith.constant 0 : index
    %0 = vector.load %arg1[%c0, %c0_0] : memref<8x16xf32, #tpu.memory_space<vmem>>, vector<8x16xf32>
    %c0_1 = arith.constant 0 : index
    %c0_2 = arith.constant 0 : index
    %1 = vector.load %arg2[%c0_1, %c0_2] : memref<16x128xf32, #tpu.memory_space<vmem>>, vector<16x128xf32>
    %cst = arith.constant dense<0.000000e+00> : vector<8x128xf32>
    %2 = tpu.matmul %0, %1, %cst {dimension_numbers = #tpu.dot_dimension_numbers<[1], [0], [0], [1], [0, 0, 1, 1], [], []>} : vector<8x16xf32>, vector<16x128xf32>, vector<8x128xf32> -> vector<8x128xf32>
    %c0_3 = arith.constant 0 : index
    %c0_4 = arith.constant 0 : index
    %3 = vector.load %arg8[%c0_3, %c0_4] : memref<8x128xf32, #tpu.memory_space<vmem>>, vector<1x128xf32>
    %4 = vector.broadcast %3 : vector<1x128xf32> to vector<8x128xf32>
    %5 = arith.addf %2, %4 : vector<8x128xf32>
    %cst_5 = arith.constant 0.00999999977 : f32
    %6 = vector.broadcast %cst_5 : f32 to vector<8x128xf32>
    %7 = arith.mulf %6, %5 : vector<8x128xf32>
    %8 = arith.maximumf %5, %7 : vector<8x128xf32>
    %c0_6 = arith.constant 0 : index
    %c0_7 = arith.constant 0 : index
    %9 = vector.load %arg3[%c0_6, %c0_7] : memref<128x128xf32, #tpu.memory_space<vmem>>, vector<128x128xf32>
    %cst_8 = arith.constant dense<0.000000e+00> : vector<8x128xf32>
    %10 = tpu.matmul %8, %9, %cst_8 {dimension_numbers = #tpu.dot_dimension_numbers<[1], [0], [0], [1], [0, 0, 1, 1], [], []>} : vector<8x128xf32>, vector<128x128xf32>, vector<8x128xf32> -> vector<8x128xf32>
    %c1 = arith.constant 1 : index
    %c0_9 = arith.constant 0 : index
    %11 = vector.load %arg8[%c1, %c0_9] : memref<8x128xf32, #tpu.memory_space<vmem>>, vector<1x128xf32>
    %12 = vector.broadcast %11 : vector<1x128xf32> to vector<8x128xf32>
    %13 = arith.addf %10, %12 : vector<8x128xf32>
    %cst_10 = arith.constant 0.00999999977 : f32
    %14 = vector.broadcast %cst_10 : f32 to vector<8x128xf32>
    %15 = arith.mulf %14, %13 : vector<8x128xf32>
    %16 = arith.maximumf %13, %15 : vector<8x128xf32>
    %c0_11 = arith.constant 0 : index
    %c0_12 = arith.constant 0 : index
    %17 = vector.load %arg4[%c0_11, %c0_12] : memref<128x128xf32, #tpu.memory_space<vmem>>, vector<128x128xf32>
    %cst_13 = arith.constant dense<0.000000e+00> : vector<8x128xf32>
    %18 = tpu.matmul %16, %17, %cst_13 {dimension_numbers = #tpu.dot_dimension_numbers<[1], [0], [0], [1], [0, 0, 1, 1], [], []>} : vector<8x128xf32>, vector<128x128xf32>, vector<8x128xf32> -> vector<8x128xf32>
    %c2 = arith.constant 2 : index
    %c0_14 = arith.constant 0 : index
    %19 = vector.load %arg8[%c2, %c0_14] : memref<8x128xf32, #tpu.memory_space<vmem>>, vector<1x128xf32>
    %20 = vector.broadcast %19 : vector<1x128xf32> to vector<8x128xf32>
    %21 = arith.addf %18, %20 : vector<8x128xf32>
    %cst_15 = arith.constant 0.00999999977 : f32
    %22 = vector.broadcast %cst_15 : f32 to vector<8x128xf32>
    %23 = arith.mulf %22, %21 : vector<8x128xf32>
    %24 = arith.maximumf %21, %23 : vector<8x128xf32>
    %c0_16 = arith.constant 0 : index
    %c0_17 = arith.constant 0 : index
    %25 = vector.load %arg5[%c0_16, %c0_17] : memref<128x128xf32, #tpu.memory_space<vmem>>, vector<128x128xf32>
    %cst_18 = arith.constant dense<0.000000e+00> : vector<8x128xf32>
    %26 = tpu.matmul %24, %25, %cst_18 {dimension_numbers = #tpu.dot_dimension_numbers<[1], [0], [0], [1], [0, 0, 1, 1], [], []>} : vector<8x128xf32>, vector<128x128xf32>, vector<8x128xf32> -> vector<8x128xf32>
    %c3 = arith.constant 3 : index
    %c0_19 = arith.constant 0 : index
    %27 = vector.load %arg8[%c3, %c0_19] : memref<8x128xf32, #tpu.memory_space<vmem>>, vector<1x128xf32>
    %28 = vector.broadcast %27 : vector<1x128xf32> to vector<8x128xf32>
    %29 = arith.addf %26, %28 : vector<8x128xf32>
    %cst_20 = arith.constant 0.00999999977 : f32
    %30 = vector.broadcast %cst_20 : f32 to vector<8x128xf32>
    %31 = arith.mulf %30, %29 : vector<8x128xf32>
    %32 = arith.maximumf %29, %31 : vector<8x128xf32>
    %c0_21 = arith.constant 0 : index
    %c0_22 = arith.constant 0 : index
    %33 = vector.load %arg6[%c0_21, %c0_22] : memref<128x128xf32, #tpu.memory_space<vmem>>, vector<128x128xf32>
    %cst_23 = arith.constant dense<0.000000e+00> : vector<8x128xf32>
    %34 = tpu.matmul %32, %33, %cst_23 {dimension_numbers = #tpu.dot_dimension_numbers<[1], [0], [0], [1], [0, 0, 1, 1], [], []>} : vector<8x128xf32>, vector<128x128xf32>, vector<8x128xf32> -> vector<8x128xf32>
    %c4 = arith.constant 4 : index
    %c0_24 = arith.constant 0 : index
    %35 = vector.load %arg8[%c4, %c0_24] : memref<8x128xf32, #tpu.memory_space<vmem>>, vector<1x128xf32>
    %36 = vector.broadcast %35 : vector<1x128xf32> to vector<8x128xf32>
    %37 = arith.addf %34, %36 : vector<8x128xf32>
    %cst_25 = arith.constant 0.00999999977 : f32
    %38 = vector.broadcast %cst_25 : f32 to vector<8x128xf32>
    %39 = arith.mulf %38, %37 : vector<8x128xf32>
    %40 = arith.maximumf %37, %39 : vector<8x128xf32>
    %c0_26 = arith.constant 0 : index
    %c0_27 = arith.constant 0 : index
    %41 = vector.load %arg7[%c0_26, %c0_27] : memref<128x128xf32, #tpu.memory_space<vmem>>, vector<128x128xf32>
    %cst_28 = arith.constant dense<0.000000e+00> : vector<8x128xf32>
    %42 = tpu.matmul %40, %41, %cst_28 {dimension_numbers = #tpu.dot_dimension_numbers<[1], [0], [0], [1], [0, 0, 1, 1], [], []>} : vector<8x128xf32>, vector<128x128xf32>, vector<8x128xf32> -> vector<8x128xf32>
    %c5 = arith.constant 5 : index
    %c0_29 = arith.constant 0 : index
    %43 = vector.load %arg8[%c5, %c0_29] : memref<8x128xf32, #tpu.memory_space<vmem>>, vector<1x128xf32>
    %44 = vector.broadcast %43 : vector<1x128xf32> to vector<8x128xf32>
    %45 = arith.addf %42, %44 : vector<8x128xf32>
    %c0_30 = arith.constant 0 : index
    %c0_31 = arith.constant 0 : index
    %46 = vector.load %arg9[%c0_30, %c0_31] : memref<8x128xf32, #tpu.memory_space<vmem>>, vector<8x128xf32>
    tpu.vector_store %arg9[%c0_30, %c0_31], %45 {strides = array<i32>} : memref<8x128xf32, #tpu.memory_space<vmem>>, vector<8x128xf32>,
    return
  }
  func.func @transform_0(%arg0: i32) -> (i32, i32) {
    %c0_i32 = arith.constant 0 : i32
    %c0_i32_0 = arith.constant 0 : i32
    return %arg0, %c0_i32 : i32, i32
  }
  func.func @transform_1(%arg0: i32) -> (i32, i32) {
    %c0_i32 = arith.constant 0 : i32
    %c0_i32_0 = arith.constant 0 : i32
    %c0_i32_1 = arith.constant 0 : i32
    return %c0_i32, %c0_i32_0 : i32, i32
  }
  func.func @transform_2(%arg0: i32) -> (i32, i32) {
    %c0_i32 = arith.constant 0 : i32
    %c0_i32_0 = arith.constant 0 : i32
    %c0_i32_1 = arith.constant 0 : i32
    return %c0_i32, %c0_i32_0 : i32, i32
  }
  func.func @transform_3(%arg0: i32) -> (i32, i32) {
    %c0_i32 = arith.constant 0 : i32
    %c0_i32_0 = arith.constant 0 : i32
    %c0_i32_1 = arith.constant 0 : i32
    return %c0_i32, %c0_i32_0 : i32, i32
  }
  func.func @transform_4(%arg0: i32) -> (i32, i32) {
    %c0_i32 = arith.constant 0 : i32
    %c0_i32_0 = arith.constant 0 : i32
    %c0_i32_1 = arith.constant 0 : i32
    return %c0_i32, %c0_i32_0 : i32, i32
  }
  func.func @transform_5(%arg0: i32) -> (i32, i32) {
    %c0_i32 = arith.constant 0 : i32
    %c0_i32_0 = arith.constant 0 : i32
    %c0_i32_1 = arith.constant 0 : i32
    return %c0_i32, %c0_i32_0 : i32, i32
  }
  func.func @transform_6(%arg0: i32) -> (i32, i32) {
    %c0_i32 = arith.constant 0 : i32
    %c0_i32_0 = arith.constant 0 : i32
    %c0_i32_1 = arith.constant 0 : i32
    return %c0_i32, %c0_i32_0 : i32, i32
  }
  func.func @transform_7(%arg0: i32) -> (i32, i32) {
    %c0_i32 = arith.constant 0 : i32
    %c0_i32_0 = arith.constant 0 : i32
    %c0_i32_1 = arith.constant 0 : i32
    return %c0_i32, %c0_i32_0 : i32, i32
  }
  func.func @transform_8(%arg0: i32) -> (i32, i32) {
    %c0_i32 = arith.constant 0 : i32
    %c0_i32_0 = arith.constant 0 : i32
    return %arg0, %c0_i32 : i32, i32
  }
}

</mosaic_0001>

<bundles_post_ra>
// kernel: model_regv4_lr_forward.1
= control target key start
LH: loop header
LB: loop body
LE: loop exit
PB: predicated region body
PF: predicated region fallthrough
CT: control target
= control target key end

     0   :  { %13 = vsyncpa [#allocation3], 0  ;;  %s1485_s0 = inlined_call_operand.hbm [shape: f32[8,16], index: 0, kind: input, shape index: {}]   ;;  %s1486_s1 = inlined_call_operand.hbm [shape: f32[16,128], index: 1, kind: input, shape index: {}]   ;;  %s1487_s2 = inlined_call_operand.hbm [shape: f32[128,128], index: 2, kind: input, shape index: {}]   ;;  %s1488_s3 = inlined_call_operand.hbm [shape: f32[128,128], index: 3, kind: input, shape index: {}]   ;;  %s1489_s4 = inlined_call_operand.hbm [shape: f32[128,128], index: 4, kind: input, shape index: {}]   ;;  %s1490_s5 = inlined_call_operand.hbm [shape: f32[128,128], index: 5, kind: input, shape index: {}]   ;;  %s1491_s6 = inlined_call_operand.hbm [shape: f32[128,128], index: 6, kind: input, shape index: {}]   ;;  %s1492_s7 = inlined_call_operand.vmem [shape: f32[8,128], index: 7, kind: input, shape index: {}]   ;;  %s1493_s8 = inlined_call_operand.vmem [shape: f32[8,128], index: 8, kind: output, shape index: {}]  }
   0x1   :  { %14 = vsyncpa [#allocation5], 0 }
   0x2   :  { %15 = vsyncpa [#allocation8], 0 }
   0x3   :  { %16 = vsyncpa [#allocation11], 0  ;;  %s1252_s27 = smov [#allocation4]   ;;  %s1090_s9 = scalar_lea.hbm %s1486_s1, 256 }
   0x4   :  { %s32_s28 = sshll.u32 %s1252_s27, 4  ;;  %p1091_p0 = scmp.ne.s32.totalorder %s1486_s1, %s1090_s9  ;;  %s33_s28 = int_to_ptr.vmem [resolvable:$true] %s32_s28 }
   0x5   :  { %p1094_p1 = scmp.lt.u32.totalorder %s1090_s9, %s1486_s1 }
   0x7   :  { %p1096_p2 = pnand %p1094_p1, %p1091_p0 }
   0x9   :  { %1099 = shalt.err (!%p1096_p2)
}
   0xa   :  { %s1100_s14 = scalar_lea.vmem %s33_s28, 256  ;;  %p1105_p4 = scmp.lt.s32.totalorder %s33_s28, %s33_s28 }
   0xb   :  { %p1101_p3 = scmp.ne.s32.totalorder %s33_s28, %s1100_s14  ;;  %p1106_p5 = scmp.lt.s32.totalorder %s1100_s14, %s1100_s14 }
   0xd   :  { %p1107_p6 = por %p1106_p5, %p1105_p4 }
   0xf   :  { %p1108_p7 = pnand %p1107_p6, %p1101_p3 }
  0x11   :  { %1111 = shalt.err (!%p1108_p7)
}
  0x12   :  { %s1253_s15 = smov 128   ;;  %s1254_s16 = smov 8  }
  0x13   :  { %38 = dma.hbm_to_vmem [thread:$0]  %s1486_s1, 256, %s33_s28, [#allocation5], %s1253_s15, %s1253_s15, %s1254_s16  }
  0x14   :  { %s1255_s19 = smov [#allocation7]   ;;  %s1256_s21 = smov [#allocation10]  }
  0x15   :  { %s56_s20 = sshll.u32 %s1255_s19, 4  ;;  %s80_s22 = sshll.u32 %s1256_s21, 4  ;;  %s57_s20 = int_to_ptr.vmem [resolvable:$true] %s56_s20  ;;  %s81_s22 = int_to_ptr.vmem [resolvable:$true] %s80_s22 }
  0x16   :  { %s1112_s25 = scalar_lea.hbm %s1488_s3, 2048 }
  0x17   :  { %p1113_p8 = scmp.ne.s32.totalorder %s1488_s3, %s1112_s25  ;;  %p1116_p9 = scmp.lt.u32.totalorder %s1112_s25, %s1488_s3 }
  0x19   :  { %p1118_p10 = pnand %p1116_p9, %p1113_p8 }
  0x1b   :  { %1121 = shalt.err (!%p1118_p10)
}
  0x1c   :  { %s1122_s1 = scalar_lea.vmem %s57_s20, 2048  ;;  %p1127_p12 = scmp.lt.s32.totalorder %s57_s20, %s57_s20 }
  0x1d   :  { %p1123_p11 = scmp.ne.s32.totalorder %s57_s20, %s1122_s1  ;;  %p1128_p13 = scmp.lt.s32.totalorder %s1122_s1, %s1122_s1 }
  0x1f   :  { %p1129_p0 = por %p1128_p13, %p1127_p12 }
  0x21   :  { %p1130_p1 = pnand %p1129_p0, %p1123_p11 }
  0x23   :  { %1133 = shalt.err (!%p1130_p1)
}
  0x24   :  { %62 = dma.hbm_to_vmem [thread:$0]  %s1488_s3, 2048, %s57_s20, [#allocation8], %s1253_s15, %s1253_s15, %s1254_s16  }
  0x25   :  { %s1134_s12 = scalar_lea.hbm %s1490_s5, 2048 }
  0x26   :  { %p1135_p2 = scmp.ne.s32.totalorder %s1490_s5, %s1134_s12  ;;  %p1138_p3 = scmp.lt.u32.totalorder %s1134_s12, %s1490_s5 }
  0x28   :  { %p1140_p4 = pnand %p1138_p3, %p1135_p2 }
  0x2a   :  { %1143 = shalt.err (!%p1140_p4)
}
  0x2b   :  { %s1144_s19 = scalar_lea.vmem %s81_s22, 2048  ;;  %p1149_p6 = scmp.lt.s32.totalorder %s81_s22, %s81_s22 }
  0x2c   :  { %p1145_p5 = scmp.ne.s32.totalorder %s81_s22, %s1144_s19  ;;  %p1150_p7 = scmp.lt.s32.totalorder %s1144_s19, %s1144_s19 }
  0x2e   :  { %p1151_p8 = por %p1150_p7, %p1149_p6 }
  0x30   :  { %p1152_p9 = pnand %p1151_p8, %p1145_p5 }
  0x32   :  { %1155 = shalt.err (!%p1152_p9)
}
  0x33   :  { %86 = dma.hbm_to_vmem [thread:$0]  %s1490_s5, 2048, %s81_s22, [#allocation11], %s1253_s15, %s1253_s15, %s1254_s16  }
  0x34   :  { %s1257_s21 = smov [#allocation2]   ;;  %s1258_s24 = smov [#allocation6]  }
  0x35   :  { %s23_s23 = sshll.u32 %s1257_s21, 4  ;;  %s44_s25 = sshll.u32 %s1258_s24, 4  ;;  %s24_s23 = int_to_ptr.vmem [resolvable:$true] %s23_s23  ;;  %s45_s25 = int_to_ptr.vmem [resolvable:$true] %s44_s25 }
  0x36   :  { %s1156_s29 = scalar_lea.hbm %s1485_s0, 128 }
  0x37   :  { %p1157_p10 = scmp.ne.s32.totalorder %s1485_s0, %s1156_s29  ;;  %p1160_p11 = scmp.lt.u32.totalorder %s1156_s29, %s1485_s0 }
  0x39   :  { %p1162_p12 = pnand %p1160_p11, %p1157_p10 }
  0x3b   :  { %1165 = shalt.err (!%p1162_p12)
}
  0x3c   :  { %s1166_s5 = scalar_lea.vmem %s24_s23, 128  ;;  %p1171_p0 = scmp.lt.s32.totalorder %s24_s23, %s24_s23 }
  0x3d   :  { %p1167_p13 = scmp.ne.s32.totalorder %s24_s23, %s1166_s5  ;;  %p1172_p1 = scmp.lt.s32.totalorder %s1166_s5, %s1166_s5 }
  0x3f   :  { %p1173_p2 = por %p1172_p1, %p1171_p0 }
  0x41   :  { %p1174_p3 = pnand %p1173_p2, %p1167_p13 }
  0x43   :  { %1177 = shalt.err (!%p1174_p3)
}
  0x44   :  { %26 = dma.hbm_to_vmem [thread:$0]  %s1485_s0, 128, %s24_s23, [#allocation3]  }
  0x45   :  { %s1178_s13 = scalar_lea.hbm %s1487_s2, 2048 }
  0x46   :  { %p1179_p4 = scmp.ne.s32.totalorder %s1487_s2, %s1178_s13  ;;  %p1182_p5 = scmp.lt.u32.totalorder %s1178_s13, %s1487_s2 }
  0x48   :  { %p1184_p6 = pnand %p1182_p5, %p1179_p4 }
  0x4a   :  { %1187 = shalt.err (!%p1184_p6)
}
  0x4b   :  { %s1188_s3 = scalar_lea.vmem %s45_s25, 2048  ;;  %p1193_p8 = scmp.lt.s32.totalorder %s45_s25, %s45_s25 }
  0x4c   :  { %p1189_p7 = scmp.ne.s32.totalorder %s45_s25, %s1188_s3  ;;  %p1194_p9 = scmp.lt.s32.totalorder %s1188_s3, %s1188_s3 }
  0x4e   :  { %p1195_p10 = por %p1194_p9, %p1193_p8 }
  0x50   :  { %p1196_p11 = pnand %p1195_p10, %p1189_p7 }
  0x52   :  { %1199 = shalt.err (!%p1196_p11)
}
  0x53   :  { %50 = dma.hbm_to_vmem [thread:$0]  %s1487_s2, 2048, %s45_s25, [#allocation5], %s1253_s15, %s1253_s15, %s1254_s16  }
  0x54   :  { %s1259_s21 = smov [#allocation9]   ;;  %s1260_s24 = smov [#allocation12]  }
  0x55   :  { %s68_s23 = sshll.u32 %s1259_s21, 4  ;;  %s92_s26 = sshll.u32 %s1260_s24, 4  ;;  %s69_s23 = int_to_ptr.vmem [resolvable:$true] %s68_s23  ;;  %s93_s26 = int_to_ptr.vmem [resolvable:$true] %s92_s26 }
  0x56   :  { %s1200_s30 = scalar_lea.hbm %s1489_s4, 2048 }
  0x57   :  { %p1201_p12 = scmp.ne.s32.totalorder %s1489_s4, %s1200_s30  ;;  %p1204_p13 = scmp.lt.u32.totalorder %s1200_s30, %s1489_s4 }
  0x59   :  { %p1206_p0 = pnand %p1204_p13, %p1201_p12 }
  0x5b   :  { %1209 = shalt.err (!%p1206_p0)
}
  0x5c   :  { %s1210_s2 = scalar_lea.vmem %s69_s23, 2048  ;;  %p1215_p2 = scmp.lt.s32.totalorder %s69_s23, %s69_s23 }
  0x5d   :  { %p1211_p1 = scmp.ne.s32.totalorder %s69_s23, %s1210_s2  ;;  %p1216_p3 = scmp.lt.s32.totalorder %s1210_s2, %s1210_s2 }
  0x5f   :  { %p1217_p4 = por %p1216_p3, %p1215_p2 }
  0x61   :  { %p1218_p5 = pnand %p1217_p4, %p1211_p1 }
  0x63   :  { %1221 = shalt.err (!%p1218_p5)
}
  0x64   :  { %74 = dma.hbm_to_vmem [thread:$0]  %s1489_s4, 2048, %s69_s23, [#allocation8], %s1253_s15, %s1253_s15, %s1254_s16  }
  0x65   :  { %s1222_s12 = scalar_lea.hbm %s1491_s6, 2048 }
  0x66   :  { %p1223_p6 = scmp.ne.s32.totalorder %s1491_s6, %s1222_s12  ;;  %p1226_p7 = scmp.lt.u32.totalorder %s1222_s12, %s1491_s6 }
  0x68   :  { %p1228_p8 = pnand %p1226_p7, %p1223_p6 }
  0x6a   :  { %1231 = shalt.err (!%p1228_p8)
}
  0x6b   :  { %s1232_s19 = scalar_lea.vmem %s93_s26, 2048  ;;  %p1237_p10 = scmp.lt.s32.totalorder %s93_s26, %s93_s26 }
  0x6c   :  { %p1233_p9 = scmp.ne.s32.totalorder %s93_s26, %s1232_s19  ;;  %p1238_p11 = scmp.lt.s32.totalorder %s1232_s19, %s1232_s19 }
  0x6e   :  { %p1239_p12 = por %p1238_p11, %p1237_p10 }
  0x70   :  { %p1240_p13 = pnand %p1239_p12, %p1233_p9 }
  0x72   :  { %1243 = shalt.err (!%p1240_p13)
}
  0x73   :  { %98 = dma.hbm_to_vmem [thread:$0]  %s1491_s6, 2048, %s93_s26, [#allocation11], %s1253_s15, %s1253_s15, %s1254_s16  }
  0x74   :  { %1244 = dma.done.wait [#allocation3], 128  }
  0x75   :  { %1245 = vsyncadd [#allocation3], 4294967168 }
  0x76   :  { %1246 = dma.done.wait [#allocation5], 2304  }
  0x77   :  { %1247 = vsyncadd [#allocation5], 4294964992 }
  0x78   :  { %1248 = dma.done.wait [#allocation8], 4096  }
  0x79   :  { %1249 = vsyncadd [#allocation8], 4294963200 }
  0x7a   :  { %1250 = dma.done.wait [#allocation11], 4096  }
  0x7b   :  { %1251 = vsyncadd [#allocation11], 4294963200  ;;  %v1261_v0 = vmov 0.0|0.0   ;;  %vm1262_vm0 = vmmov 0   ;;  %v1263_v1 = vmov 0.0   ;;  %v123_v2 = vld [vmem:[#allocation4] sm:$0xff] }
  0x7c   :  { %955 = vmatprep.subr.bf16.mxu0 %v1261_v0  ;;  %777 = vmatprep.mubr.msk.f32.mxu0 %vm1262_vm0, %v1263_v1  ;;  %v124_v3 = vld [vmem:[#allocation4 + $0x8] sm:$0xff]  ;;  %v206_v5 = vld [vmem:[#allocation6] sm:$0xff]  ;;  %v207_v6 = vld [vmem:[#allocation6 + $0x8] sm:$0xff]  ;;  %vm130_vm1 = vcmask 130048  }
  0x7d   :  { %958 = vmatprep.subr.bf16.mxu1 %v1261_v0  ;;  %812 = vmatprep.mubr.msk.f32.mxu1 %vm1262_vm0, %v1263_v1  ;;  %v956_v4 = vpack.c.bf16 %v124_v3, %v123_v2  ;;  %v208_v7 = vld [vmem:[#allocation6 + $0x10] sm:$0xff]  ;;  %v959_v8 = vpack.c.bf16 %v207_v6, %v206_v5  ;;  %v209_v9 = vld [vmem:[#allocation6 + $0x18] sm:$0xff]  ;;  %v122_v10 = vld [vmem:[#allocation2] sm:$0xff] }
  0x7e   :  { %v962_v11 = vpack.c.bf16 %v209_v9, %v208_v7  ;;  %v210_v12 = vld [vmem:[#allocation6 + $0x20] sm:$0xff]  ;;  %v211_v13 = vld [vmem:[#allocation6 + $0x28] sm:$0xff]  ;;  %v212_v15 = vld [vmem:[#allocation6 + $0x30] sm:$0xff] }
  0x7f   :  { %957 = vmatpush3.bf16.msra.mxu0 %v956_v4  ;;  %960 = vmatpush3.bf16.msra.mxu1 %v959_v8  ;;  %v965_v14 = vpack.c.bf16 %v211_v13, %v210_v12  ;;  %v213_v16 = vld [vmem:[#allocation6 + $0x38] sm:$0xff]  ;;  %v214_v18 = vld [vmem:[#allocation6 + $0x40] sm:$0xff]  ;;  %v215_v19 = vld [vmem:[#allocation6 + $0x48] sm:$0xff] }
  0x80   :  { %982 = vmatprep.subr.bf16.mxu0 %v1261_v0  ;;  %961 = vmatprep.subr.bf16.mxu1 %v1261_v0  ;;  %v968_v17 = vpack.c.bf16 %v213_v16, %v212_v15  ;;  %v971_v20 = vpack.c.bf16 %v215_v19, %v214_v18  ;;  %v216_v21 = vld [vmem:[#allocation6 + $0x50] sm:$0xff]  ;;  %v217_v22 = vld [vmem:[#allocation6 + $0x58] sm:$0xff]  ;;  %v218_v24 = vld [vmem:[#allocation6 + $0x60] sm:$0xff] }
  0x81   :  { %v974_v23 = vpack.c.bf16 %v217_v22, %v216_v21  ;;  %v219_v25 = vld [vmem:[#allocation6 + $0x68] sm:$0xff]  ;;  %v220_v27 = vld [vmem:[#allocation6 + $0x70] sm:$0xff]  ;;  %v221_v28 = vld [vmem:[#allocation6 + $0x78] sm:$0xff] }
  0x82   :  { %778 = vmatmul.mubr.msk.f32.vlgmr.msra.gmra.mrb[0].mxu0 %vm130_vm1, %v122_v10  ;;  %v977_v26 = vpack.c.bf16 %v219_v25, %v218_v24  ;;  %v980_v29 = vpack.c.bf16 %v221_v28, %v220_v27  ;;  %v299_v30 = vld [vmem:[#allocation7] sm:$0xff]  ;;  %v300_v31 = vld [vmem:[#allocation7 + $0x8] sm:$0xff]  ;;  %v301_v32 = vld [vmem:[#allocation7 + $0x10] sm:$0xff] }
  0x83   :  { %847 = vmatprep.mubr.msk.f32.mxu0 %vm1262_vm0, %v1263_v1  ;;  %963 = vmatpush3.bf16.msra.mxu1 %v962_v11  ;;  %v983_v33 = vpack.c.bf16 %v300_v31, %v299_v30  ;;  %v302_v34 = vld [vmem:[#allocation7 + $0x18] sm:$0xff]  ;;  %v303_v36 = vld [vmem:[#allocation7 + $0x20] sm:$0xff]  ;;  %v304_v37 = vld [vmem:[#allocation7 + $0x28] sm:$0xff] }
  0x84   :  { %964 = vmatprep.subr.bf16.mxu1 %v1261_v0  ;;  %v986_v35 = vpack.c.bf16 %v302_v34, %v301_v32  ;;  %v989_v38 = vpack.c.bf16 %v304_v37, %v303_v36  ;;  %v305_v39 = vld [vmem:[#allocation7 + $0x30] sm:$0xff]  ;;  %v306_v40 = vld [vmem:[#allocation7 + $0x38] sm:$0xff]  ;;  %v307_v42 = vld [vmem:[#allocation7 + $0x40] sm:$0xff] }
  0x85   :  { %984 = vmatpush3.bf16.msra.mxu0 %v983_v33  ;;  %v992_v41 = vpack.c.bf16 %v306_v40, %v305_v39  ;;  %v308_v43 = vld [vmem:[#allocation7 + $0x48] sm:$0xff]  ;;  %v309_v45 = vld [vmem:[#allocation7 + $0x50] sm:$0xff]  ;;  %v310_v46 = vld [vmem:[#allocation7 + $0x58] sm:$0xff] }
  0x86   :  { %985 = vmatprep.subr.bf16.mxu0 %v1261_v0  ;;  %v995_v44 = vpack.c.bf16 %v308_v43, %v307_v42  ;;  %v998_v47 = vpack.c.bf16 %v310_v46, %v309_v45  ;;  %v678_v48 = vld [vmem:[%s1492_s7] ss:$0 sm:$0xff]  ;;  %v311_v54 = vld [vmem:[#allocation7 + $0x60] sm:$0xff]  ;;  %v313_v57 = vld [vmem:[#allocation7 + $0x70] sm:$0xff] }
  0x87   :  { %966 = vmatpush3.bf16.msra.mxu1 %v965_v14  ;;  %v312_v55 = vld [vmem:[#allocation7 + $0x68] sm:$0xff]  ;;  %v314_v58 = vld [vmem:[#allocation7 + $0x78] sm:$0xff]  ;;  %v392_v60 = vld [vmem:[#allocation9] sm:$0xff] }
  0x88   :  { %967 = vmatprep.subr.bf16.mxu1 %v1261_v0  ;;  %v1001_v56 = vpack.c.bf16 %v312_v55, %v311_v54  ;;  %v1004_v59 = vpack.c.bf16 %v314_v58, %v313_v57  ;;  %v393_v61 = vld [vmem:[#allocation9 + $0x8] sm:$0xff]  ;;  %v394_v62 = vld [vmem:[#allocation9 + $0x10] sm:$0xff]  ;;  %v395_v2 = vld [vmem:[#allocation9 + $0x18] sm:$0xff] }
  0x89   :  { %987 = vmatpush3.bf16.msra.mxu0 %v986_v35  ;;  %v1007_v63 = vpack.c.bf16 %v393_v61, %v392_v60  ;;  %v1010_v3 = vpack.c.bf16 %v395_v2, %v394_v62  ;;  %v396_v4 = vld [vmem:[#allocation9 + $0x20] sm:$0xff]  ;;  %v397_v5 = vld [vmem:[#allocation9 + $0x28] sm:$0xff]  ;;  %v398_v7 = vld [vmem:[#allocation9 + $0x30] sm:$0xff] }
  0x8a   :  { %988 = vmatprep.subr.bf16.mxu0 %v1261_v0  ;;  %v1013_v6 = vpack.c.bf16 %v397_v5, %v396_v4  ;;  %v399_v8 = vld [vmem:[#allocation9 + $0x38] sm:$0xff]  ;;  %v400_v10 = vld [vmem:[#allocation9 + $0x40] sm:$0xff]  ;;  %v401_v11 = vld [vmem:[#allocation9 + $0x48] sm:$0xff] }
  0x8b   :  { %969 = vmatpush3.bf16.msra.mxu1 %v968_v17  ;;  %v1016_v9 = vpack.c.bf16 %v399_v8, %v398_v7  ;;  %v1019_v12 = vpack.c.bf16 %v401_v11, %v400_v10  ;;  %v402_v13 = vld [vmem:[#allocation9 + $0x50] sm:$0xff]  ;;  %v403_v14 = vld [vmem:[#allocation9 + $0x58] sm:$0xff]  ;;  %v680_v16 = vld [vmem:[%s1492_s7 + $0x1] ss:$0 sm:$0xff] }
  0x8c   :  { %970 = vmatprep.subr.bf16.mxu1 %v1261_v0  ;;  %v1022_v15 = vpack.c.bf16 %v403_v14, %v402_v13  ;;  %v404_v22 = vld [vmem:[#allocation9 + $0x60] sm:$0xff]  ;;  %v406_v25 = vld [vmem:[#allocation9 + $0x70] sm:$0xff]  ;;  %v488_v32 = vld [vmem:[#allocation10 + $0x18] sm:$0xff] }
  0x8d   :  { %990 = vmatpush3.bf16.msra.mxu0 %v989_v38  ;;  %v485_v28 = vld [vmem:[#allocation10] sm:$0xff]  ;;  %v487_v30 = vld [vmem:[#allocation10 + $0x10] sm:$0xff]  ;;  %v490_v35 = vld [vmem:[#allocation10 + $0x28] sm:$0xff] }
  0x8e   :  { %991 = vmatprep.subr.bf16.mxu0 %v1261_v0  ;;  %v1034_v33 = vpack.c.bf16 %v488_v32, %v487_v30  ;;  %v489_v34 = vld [vmem:[#allocation10 + $0x20] sm:$0xff]  ;;  %v491_v37 = vld [vmem:[#allocation10 + $0x30] sm:$0xff]  ;;  %v492_v38 = vld [vmem:[#allocation10 + $0x38] sm:$0xff] }
  0x8f   :  { %972 = vmatpush3.bf16.msra.mxu1 %v971_v20  ;;  %v1037_v36 = vpack.c.bf16 %v490_v35, %v489_v34  ;;  %v1040_v39 = vpack.c.bf16 %v492_v38, %v491_v37  ;;  %v493_v40 = vld [vmem:[#allocation10 + $0x40] sm:$0xff]  ;;  %v495_v43 = vld [vmem:[#allocation10 + $0x50] sm:$0xff]  ;;  %v681_v46 = vld [vmem:[%s1492_s7 + $0x2] ss:$0 sm:$0xff] }
  0x90   :  { %973 = vmatprep.subr.bf16.mxu1 %v1261_v0  ;;  %v499_v55 = vld [vmem:[#allocation10 + $0x70] sm:$0xff]  ;;  %v578_v58 = vld [vmem:[#allocation12] sm:$0xff]  ;;  %v581_v62 = vld [vmem:[#allocation12 + $0x18] sm:$0xff] }
  0x91   :  { %993 = vmatpush3.bf16.msra.mxu0 %v992_v41  ;;  %v494_v41 = vld [vmem:[#allocation10 + $0x48] sm:$0xff]  ;;  %v580_v60 = vld [vmem:[#allocation12 + $0x10] sm:$0xff]  ;;  %v585_v5 = vld [vmem:[#allocation12 + $0x38] sm:$0xff] }
  0x92   :  { %994 = vmatprep.subr.bf16.mxu0 %v1261_v0  ;;  %v1043_v42 = vpack.c.bf16 %v494_v41, %v493_v40  ;;  %v583_v2 = vld [vmem:[#allocation12 + $0x28] sm:$0xff]  ;;  %v584_v4 = vld [vmem:[#allocation12 + $0x30] sm:$0xff]  ;;  %v586_v7 = vld [vmem:[#allocation12 + $0x40] sm:$0xff] }
  0x93   :  { %975 = vmatpush3.bf16.msra.mxu1 %v974_v23  ;;  %v405_v23 = vld [vmem:[#allocation9 + $0x68] sm:$0xff]  ;;  %v588_v10 = vld [vmem:[#allocation12 + $0x50] sm:$0xff]  ;;  %v589_v11 = vld [vmem:[#allocation12 + $0x58] sm:$0xff] }
  0x94   :  { %976 = vmatprep.subr.bf16.mxu1 %v1261_v0  ;;  %v1025_v24 = vpack.c.bf16 %v405_v23, %v404_v22  ;;  %v587_v8 = vld [vmem:[#allocation12 + $0x48] sm:$0xff]  ;;  %v592_v22 = vld [vmem:[#allocation12 + $0x70] sm:$0xff]  ;;  %v593_v23 = vld [vmem:[#allocation12 + $0x78] sm:$0xff] }
  0x95   :  { %996 = vmatpush3.bf16.msra.mxu0 %v995_v44  ;;  %v496_v44 = vld [vmem:[#allocation10 + $0x58] sm:$0xff]  ;;  %v682_v13 = vld [vmem:[%s1492_s7 + $0x3] ss:$0 sm:$0xff] }
  0x96   :  { %997 = vmatprep.subr.bf16.mxu0 %v1261_v0  ;;  %v1046_v45 = vpack.c.bf16 %v496_v44, %v495_v43 }
  0x97   :  { %978 = vmatpush3.bf16.msra.mxu1 %v977_v26  ;;  %v407_v26 = vld [vmem:[#allocation9 + $0x78] sm:$0xff] }
  0x98   :  { %979 = vmatprep.subr.bf16.mxu1 %v1261_v0  ;;  %v1028_v27 = vpack.c.bf16 %v407_v26, %v406_v25  ;;  %v683_v25 = vld [vmem:[%s1492_s7 + $0x4] ss:$0 sm:$0xff] }
  0x99   :  { %999 = vmatpush3.bf16.msra.mxu0 %v998_v47 }
  0x9a   :  { %1000 = vmatprep.subr.bf16.mxu0 %v1261_v0 }
  0x9b   :  { %981 = vmatpush3.bf16.msra.mxu1 %v980_v29  ;;  %v486_v29 = vld [vmem:[#allocation10 + $0x8] sm:$0xff] }
  0x9c   :  { %1006 = vmatprep.subr.bf16.mxu1 %v1261_v0  ;;  %v1031_v31 = vpack.c.bf16 %v486_v29, %v485_v28 }
  0x9d   :  { %1002 = vmatpush3.bf16.msra.mxu0 %v1001_v56  ;;  %v500_v56 = vld [vmem:[#allocation10 + $0x78] sm:$0xff] }
  0x9e   :  { %1003 = vmatprep.subr.bf16.mxu0 %v1261_v0  ;;  %v1052_v57 = vpack.c.bf16 %v500_v56, %v499_v55 }
  0xa1   :  { %1005 = vmatpush3.bf16.msra.mxu0 %v1004_v59  ;;  %v579_v59 = vld [vmem:[#allocation12 + $0x8] sm:$0xff] }
  0xa2   :  { %1030 = vmatprep.subr.bf16.mxu0 %v1261_v0  ;;  %v1055_v61 = vpack.c.bf16 %v579_v59, %v578_v58 }
 0x155   :  { %v200_v49 = vpop.f32.mrb[0].mxu0 }
 0x156   :  { %v201_v50 = vadd.f32 %v678_v48, %v200_v49  ;;  %v779_v51 = vpop.f32.mrb[1].mxu0 }
 0x158   :  { %v204_v52 = vmul.f32 0.01, %v201_v50 }
 0x15a   :  { %v205_v53 = vmax.f32 %v201_v50, %v204_v52  ;;  %v497_v52 = vld [vmem:[#allocation10 + $0x60] sm:$0xff] }
 0x15c   :  { %813 = vmatmul.mubr.f32.vlgmr.msra.gmra.mrb[0].mxu1 %v205_v53  ;;  %v498_v53 = vld [vmem:[#allocation10 + $0x68] sm:$0xff] }
 0x15d   :  { %882 = vmatprep.mubr.msk.f32.mxu1 %vm1262_vm0, %v1263_v1  ;;  %1008 = vmatpush3.bf16.msra.mxu1 %v1007_v63  ;;  %v1049_v54 = vpack.c.bf16 %v498_v53, %v497_v52  ;;  %v1058_v63 = vpack.c.bf16 %v581_v62, %v580_v60 }
 0x15e   :  { %1009 = vmatprep.subr.bf16.mxu1 %v1261_v0 }
 0x161   :  { %1011 = vmatpush3.bf16.msra.mxu1 %v1010_v3 }
 0x162   :  { %1012 = vmatprep.subr.bf16.mxu1 %v1261_v0 }
 0x165   :  { %1014 = vmatpush3.bf16.msra.mxu1 %v1013_v6  ;;  %v1064_v6 = vpack.c.bf16 %v585_v5, %v584_v4 }
 0x166   :  { %1015 = vmatprep.subr.bf16.mxu1 %v1261_v0 }
 0x169   :  { %1017 = vmatpush3.bf16.msra.mxu1 %v1016_v9  ;;  %v1067_v9 = vpack.c.bf16 %v587_v8, %v586_v7 }
 0x16a   :  { %1018 = vmatprep.subr.bf16.mxu1 %v1261_v0 }
 0x16d   :  { %1020 = vmatpush3.bf16.msra.mxu1 %v1019_v12  ;;  %v1070_v12 = vpack.c.bf16 %v589_v11, %v588_v10 }
 0x16e   :  { %1021 = vmatprep.subr.bf16.mxu1 %v1261_v0 }
 0x171   :  { %1023 = vmatpush3.bf16.msra.mxu1 %v1022_v15 }
 0x172   :  { %1024 = vmatprep.subr.bf16.mxu1 %v1261_v0 }
 0x175   :  { %1026 = vmatpush3.bf16.msra.mxu1 %v1025_v24  ;;  %v1076_v24 = vpack.c.bf16 %v593_v23, %v592_v22 }
 0x176   :  { %1027 = vmatprep.subr.bf16.mxu1 %v1261_v0 }
 0x179   :  { %1029 = vmatpush3.bf16.msra.mxu1 %v1028_v27 }
 0x17a   :  { %1054 = vmatprep.subr.bf16.mxu1 %v1261_v0 }
 0x22f   :  { %v293_v17 = vpop.f32.mrb[0].mxu1 }
 0x230   :  { %v294_v18 = vadd.f32 %v680_v16, %v293_v17  ;;  %v814_v19 = vpop.f32.mrb[1].mxu1 }
 0x231   :  { %v590_v19 = vld [vmem:[#allocation12 + $0x60] sm:$0xff] }
 0x232   :  { %v297_v20 = vmul.f32 0.01, %v294_v18 }
 0x234   :  { %v298_v21 = vmax.f32 %v294_v18, %v297_v20  ;;  %v591_v20 = vld [vmem:[#allocation12 + $0x68] sm:$0xff] }
 0x236   :  { %848 = vmatmul.mubr.f32.vlgmr.msra.gmra.mrb[2].mxu0 %v298_v21  ;;  %v1073_v21 = vpack.c.bf16 %v591_v20, %v590_v19 }
 0x237   :  { %917 = vmatprep.mubr.msk.f32.mxu0 %vm1262_vm0, %v1263_v1  ;;  %1032 = vmatpush3.bf16.msra.mxu0 %v1031_v31  ;;  %v684_v31 = vld [vmem:[%s1492_s7 + $0x5] ss:$0 sm:$0xff] }
 0x238   :  { %1033 = vmatprep.subr.bf16.mxu0 %v1261_v0 }
 0x23b   :  { %1035 = vmatpush3.bf16.msra.mxu0 %v1034_v33 }
 0x23c   :  { %1036 = vmatprep.subr.bf16.mxu0 %v1261_v0 }
 0x23f   :  { %1038 = vmatpush3.bf16.msra.mxu0 %v1037_v36 }
 0x240   :  { %1039 = vmatprep.subr.bf16.mxu0 %v1261_v0 }
 0x243   :  { %1041 = vmatpush3.bf16.msra.mxu0 %v1040_v39 }
 0x244   :  { %1042 = vmatprep.subr.bf16.mxu0 %v1261_v0 }
 0x247   :  { %1044 = vmatpush3.bf16.msra.mxu0 %v1043_v42 }
 0x248   :  { %1045 = vmatprep.subr.bf16.mxu0 %v1261_v0 }
 0x24b   :  { %1047 = vmatpush3.bf16.msra.mxu0 %v1046_v45 }
 0x24c   :  { %1048 = vmatprep.subr.bf16.mxu0 %v1261_v0 }
 0x24f   :  { %1050 = vmatpush3.bf16.msra.mxu0 %v1049_v54 }
 0x250   :  { %1051 = vmatprep.subr.bf16.mxu0 %v1261_v0 }
 0x253   :  { %1053 = vmatpush3.bf16.msra.mxu0 %v1052_v57 }
 0x309   :  { %v386_v47 = vpop.f32.mrb[2].mxu0 }
 0x30a   :  { %v387_v48 = vadd.f32 %v681_v46, %v386_v47  ;;  %v849_v49 = vpop.f32.mrb[3].mxu0 }
 0x30c   :  { %v390_v50 = vmul.f32 0.01, %v387_v48 }
 0x30e   :  { %v391_v51 = vmax.f32 %v387_v48, %v390_v50 }
 0x310   :  { %883 = vmatmul.mubr.f32.vlgmr.msra.gmra.mrb[2].mxu1 %v391_v51 }
 0x311   :  { %952 = vmatprep.mubr.msk.f32.mxu1 %vm1262_vm0, %v1263_v1  ;;  %1056 = vmatpush3.bf16.msra.mxu1 %v1055_v61  ;;  %v582_v1 = vld [vmem:[#allocation12 + $0x20] sm:$0xff] }
 0x312   :  { %1057 = vmatprep.subr.bf16.mxu1 %v1261_v0  ;;  %v1061_v3 = vpack.c.bf16 %v583_v2, %v582_v1 }
 0x315   :  { %1059 = vmatpush3.bf16.msra.mxu1 %v1058_v63 }
 0x316   :  { %1060 = vmatprep.subr.bf16.mxu1 %v1261_v0 }
 0x319   :  { %1062 = vmatpush3.bf16.msra.mxu1 %v1061_v3 }
 0x31a   :  { %1063 = vmatprep.subr.bf16.mxu1 %v1261_v0 }
 0x31d   :  { %1065 = vmatpush3.bf16.msra.mxu1 %v1064_v6 }
 0x31e   :  { %1066 = vmatprep.subr.bf16.mxu1 %v1261_v0 }
 0x321   :  { %1068 = vmatpush3.bf16.msra.mxu1 %v1067_v9 }
 0x322   :  { %1069 = vmatprep.subr.bf16.mxu1 %v1261_v0 }
 0x325   :  { %1071 = vmatpush3.bf16.msra.mxu1 %v1070_v12 }
 0x326   :  { %1072 = vmatprep.subr.bf16.mxu1 %v1261_v0 }
 0x329   :  { %1074 = vmatpush3.bf16.msra.mxu1 %v1073_v21 }
 0x32a   :  { %1075 = vmatprep.subr.bf16.mxu1 %v1261_v0 }
 0x32d   :  { %1077 = vmatpush3.bf16.msra.mxu1 %v1076_v24 }
 0x3e3   :  { %v479_v14 = vpop.f32.mrb[2].mxu1 }
 0x3e4   :  { %v480_v15 = vadd.f32 %v682_v13, %v479_v14  ;;  %v884_v16 = vpop.f32.mrb[3].mxu1 }
 0x3e6   :  { %v483_v17 = vmul.f32 0.01, %v480_v15 }
 0x3e8   :  { %v484_v18 = vmax.f32 %v480_v15, %v483_v17 }
 0x3ea   :  { %918 = vmatmul.mubr.f32.vlgmr.msra.gmra.mrb[4].mxu0 %v484_v18 }
 0x4bd   :  { %v572_v26 = vpop.f32.mrb[4].mxu0 }
 0x4be   :  { %v573_v27 = vadd.f32 %v683_v25, %v572_v26  ;;  %v919_v28 = vpop.f32.mrb[5].mxu0 }
 0x4c0   :  { %v576_v29 = vmul.f32 0.01, %v573_v27 }
 0x4c2   :  { %v577_v30 = vmax.f32 %v573_v27, %v576_v29 }
 0x4c4   :  { %953 = vmatmul.mubr.f32.vlgmr.msra.gmra.mrb[4].mxu1 %v577_v30 }
 0x597   :  { %v665_v32 = vpop.f32.mrb[4].mxu1 }
 0x598   :  { %v666_v0 = vadd.f32 %v684_v31, %v665_v32  ;;  %v954_v33 = vpop.f32.mrb[5].mxu1 }
 0x59a   :  { %669 = vst [vmem:[%s1493_s8] sm:$0xff] %v666_v0 }
 0x59b   :  { %674 = vsyncpa [#allocation3], 1 }
 0x59c   :  { %675 = vsyncpa [#allocation5], 1 }
 0x59d   :  { %676 = vsyncpa [#allocation8], 1 }
 0x59e   :  { %677 = vsyncpa [#allocation11], 1 }

// kernel: model_regv4_lr_forward.1
= control target key start
LH: loop header
LB: loop body
LE: loop exit
PB: predicated region body
PF: predicated region fallthrough
CT: control target
= control target key end

     0   :  { %13 = vsyncpa [#allocation3], 0  ;;  %s1485_s0 = inlined_call_operand.hbm [shape: f32[8,16], index: 0, kind: input, shape index: {}]   ;;  %s1486_s1 = inlined_call_operand.hbm [shape: f32[16,128], index: 1, kind: input, shape index: {}]   ;;  %s1487_s2 = inlined_call_operand.hbm [shape: f32[128,128], index: 2, kind: input, shape index: {}]   ;;  %s1488_s3 = inlined_call_operand.hbm [shape: f32[128,128], index: 3, kind: input, shape index: {}]   ;;  %s1489_s4 = inlined_call_operand.hbm [shape: f32[128,128], index: 4, kind: input, shape index: {}]   ;;  %s1490_s5 = inlined_call_operand.hbm [shape: f32[128,128], index: 5, kind: input, shape index: {}]   ;;  %s1491_s6 = inlined_call_operand.hbm [shape: f32[128,128], index: 6, kind: input, shape index: {}]   ;;  %s1492_s7 = inlined_call_operand.vmem [shape: f32[8,128], index: 7, kind: input, shape index: {}]   ;;  %s1493_s8 = inlined_call_operand.vmem [shape: f32[8,128], index: 8, kind: output, shape index: {}]  }
   0x1   :  { %14 = vsyncpa [#allocation5], 0 }
   0x2   :  { %15 = vsyncpa [#allocation8], 0 }
   0x3   :  { %16 = vsyncpa [#allocation11], 0  ;;  %s1252_s27 = smov [#allocation4]   ;;  %s1090_s9 = scalar_lea.hbm %s1486_s1, 256 }
   0x4   :  { %s32_s28 = sshll.u32 %s1252_s27, 4  ;;  %p1091_p0 = scmp.ne.s32.totalorder %s1486_s1, %s1090_s9  ;;  %s33_s28 = int_to_ptr.vmem [resolvable:$true] %s32_s28 }
   0x5   :  { %p1094_p1 = scmp.lt.u32.totalorder %s1090_s9, %s1486_s1 }
   0x7   :  { %p1096_p2 = pnand %p1094_p1, %p1091_p0 }
   0x9   :  { %1099 = shalt.err (!%p1096_p2)
}
   0xa   :  { %s1100_s14 = scalar_lea.vmem %s33_s28, 256  ;;  %p1105_p4 = scmp.lt.s32.totalorder %s33_s28, %s33_s28 }
   0xb   :  { %p1101_p3 = scmp.ne.s32.totalorder %s33_s28, %s1100_s14  ;;  %p1106_p5 = scmp.lt.s32.totalorder %s1100_s14, %s1100_s14 }
   0xd   :  { %p1107_p6 = por %p1106_p5, %p1105_p4 }
   0xf   :  { %p1108_p7 = pnand %p1107_p6, %p1101_p3 }
  0x11   :  { %1111 = shalt.err (!%p1108_p7)
}
  0x12   :  { %s1253_s15 = smov 128   ;;  %s1254_s16 = smov 8  }
  0x13   :  { %38 = dma.hbm_to_vmem [thread:$0]  %s1486_s1, 256, %s33_s28, [#allocation5], %s1253_s15, %s1253_s15, %s1254_s16  }
  0x14   :  { %s1255_s19 = smov [#allocation7]   ;;  %s1256_s21 = smov [#allocation10]  }
  0x15   :  { %s56_s20 = sshll.u32 %s1255_s19, 4  ;;  %s80_s22 = sshll.u32 %s1256_s21, 4  ;;  %s57_s20 = int_to_ptr.vmem [resolvable:$true] %s56_s20  ;;  %s81_s22 = int_to_ptr.vmem [resolvable:$true] %s80_s22 }
  0x16   :  { %s1112_s25 = scalar_lea.hbm %s1488_s3, 2048 }
  0x17   :  { %p1113_p8 = scmp.ne.s32.totalorder %s1488_s3, %s1112_s25  ;;  %p1116_p9 = scmp.lt.u32.totalorder %s1112_s25, %s1488_s3 }
  0x19   :  { %p1118_p10 = pnand %p1116_p9, %p1113_p8 }
  0x1b   :  { %1121 = shalt.err (!%p1118_p10)
}
  0x1c   :  { %s1122_s1 = scalar_lea.vmem %s57_s20, 2048  ;;  %p1127_p12 = scmp.lt.s32.totalorder %s57_s20, %s57_s20 }
  0x1d   :  { %p1123_p11 = scmp.ne.s32.totalorder %s57_s20, %s1122_s1  ;;  %p1128_p13 = scmp.lt.s32.totalorder %s1122_s1, %s1122_s1 }
  0x1f   :  { %p1129_p0 = por %p1128_p13, %p1127_p12 }
  0x21   :  { %p1130_p1 = pnand %p1129_p0, %p1123_p11 }
  0x23   :  { %1133 = shalt.err (!%p1130_p1)
}
  0x24   :  { %62 = dma.hbm_to_vmem [thread:$0]  %s1488_s3, 2048, %s57_s20, [#allocation8], %s1253_s15, %s1253_s15, %s1254_s16  }
  0x25   :  { %s1134_s12 = scalar_lea.hbm %s1490_s5, 2048 }
  0x26   :  { %p1135_p2 = scmp.ne.s32.totalorder %s1490_s5, %s1134_s12  ;;  %p1138_p3 = scmp.lt.u32.totalorder %s1134_s12, %s1490_s5 }
  0x28   :  { %p1140_p4 = pnand %p1138_p3, %p1135_p2 }
  0x2a   :  { %1143 = shalt.err (!%p1140_p4)
}
  0x2b   :  { %s1144_s19 = scalar_lea.vmem %s81_s22, 2048  ;;  %p1149_p6 = scmp.lt.s32.totalorder %s81_s22, %s81_s22 }
  0x2c   :  { %p1145_p5 = scmp.ne.s32.totalorder %s81_s22, %s1144_s19  ;;  %p1150_p7 = scmp.lt.s32.totalorder %s1144_s19, %s1144_s19 }
  0x2e   :  { %p1151_p8 = por %p1150_p7, %p1149_p6 }
  0x30   :  { %p1152_p9 = pnand %p1151_p8, %p1145_p5 }
  0x32   :  { %1155 = shalt.err (!%p1152_p9)
}
  0x33   :  { %86 = dma.hbm_to_vmem [thread:$0]  %s1490_s5, 2048, %s81_s22, [#allocation11], %s1253_s15, %s1253_s15, %s1254_s16  }
  0x34   :  { %s1257_s21 = smov [#allocation2]   ;;  %s1258_s24 = smov [#allocation6]  }
  0x35   :  { %s23_s23 = sshll.u32 %s1257_s21, 4  ;;  %s44_s25 = sshll.u32 %s1258_s24, 4  ;;  %s24_s23 = int_to_ptr.vmem [resolvable:$true] %s23_s23  ;;  %s45_s25 = int_to_ptr.vmem [resolvable:$true] %s44_s25 }
  0x36   :  { %s1156_s29 = scalar_lea.hbm %s1485_s0, 128 }
  0x37   :  { %p1157_p10 = scmp.ne.s32.totalorder %s1485_s0, %s1156_s29  ;;  %p1160_p11 = scmp.lt.u32.totalorder %s1156_s29, %s1485_s0 }
  0x39   :  { %p1162_p12 = pnand %p1160_p11, %p1157_p10 }
  0x3b   :  { %1165 = shalt.err (!%p1162_p12)
}
  0x3c   :  { %s1166_s5 = scalar_lea.vmem %s24_s23, 128  ;;  %p1171_p0 = scmp.lt.s32.totalorder %s24_s23, %s24_s23 }
  0x3d   :  { %p1167_p13 = scmp.ne.s32.totalorder %s24_s23, %s1166_s5  ;;  %p1172_p1 = scmp.lt.s32.totalorder %s1166_s5, %s1166_s5 }
  0x3f   :  { %p1173_p2 = por %p1172_p1, %p1171_p0 }
  0x41   :  { %p1174_p3 = pnand %p1173_p2, %p1167_p13 }
  0x43   :  { %1177 = shalt.err (!%p1174_p3)
}
  0x44   :  { %26 = dma.hbm_to_vmem [thread:$0]  %s1485_s0, 128, %s24_s23, [#allocation3]  }
  0x45   :  { %s1178_s13 = scalar_lea.hbm %s1487_s2, 2048 }
  0x46   :  { %p1179_p4 = scmp.ne.s32.totalorder %s1487_s2, %s1178_s13  ;;  %p1182_p5 = scmp.lt.u32.totalorder %s1178_s13, %s1487_s2 }
  0x48   :  { %p1184_p6 = pnand %p1182_p5, %p1179_p4 }
  0x4a   :  { %1187 = shalt.err (!%p1184_p6)
}
  0x4b   :  { %s1188_s3 = scalar_lea.vmem %s45_s25, 2048  ;;  %p1193_p8 = scmp.lt.s32.totalorder %s45_s25, %s45_s25 }
  0x4c   :  { %p1189_p7 = scmp.ne.s32.totalorder %s45_s25, %s1188_s3  ;;  %p1194_p9 = scmp.lt.s32.totalorder %s1188_s3, %s1188_s3 }
  0x4e   :  { %p1195_p10 = por %p1194_p9, %p1193_p8 }
  0x50   :  { %p1196_p11 = pnand %p1195_p10, %p1189_p7 }
  0x52   :  { %1199 = shalt.err (!%p1196_p11)
}
  0x53   :  { %50 = dma.hbm_to_vmem [thread:$0]  %s1487_s2, 2048, %s45_s25, [#allocation5], %s1253_s15, %s1253_s15, %s1254_s16  }
  0x54   :  { %s1259_s21 = smov [#allocation9]   ;;  %s1260_s24 = smov [#allocation12]  }
  0x55   :  { %s68_s23 = sshll.u32 %s1259_s21, 4  ;;  %s92_s26 = sshll.u32 %s1260_s24, 4  ;;  %s69_s23 = int_to_ptr.vmem [resolvable:$true] %s68_s23  ;;  %s93_s26 = int_to_ptr.vmem [resolvable:$true] %s92_s26 }
  0x56   :  { %s1200_s30 = scalar_lea.hbm %s1489_s4, 2048 }
  0x57   :  { %p1201_p12 = scmp.ne.s32.totalorder %s1489_s4, %s1200_s30  ;;  %p1204_p13 = scmp.lt.u32.totalorder %s1200_s30, %s1489_s4 }
  0x59   :  { %p1206_p0 = pnand %p1204_p13, %p1201_p12 }
  0x5b   :  { %1209 = shalt.err (!%p1206_p0)
}
  0x5c   :  { %s1210_s2 = scalar_lea.vmem %s69_s23, 2048  ;;  %p1215_p2 = scmp.lt.s32.totalorder %s69_s23, %s69_s23 }
  0x5d   :  { %p1211_p1 = scmp.ne.s32.totalorder %s69_s23, %s1210_s2  ;;  %p1216_p3 = scmp.lt.s32.totalorder %s1210_s2, %s1210_s2 }
  0x5f   :  { %p1217_p4 = por %p1216_p3, %p1215_p2 }
  0x61   :  { %p1218_p5 = pnand %p1217_p4, %p1211_p1 }
  0x63   :  { %1221 = shalt.err (!%p1218_p5)
}
  0x64   :  { %74 = dma.hbm_to_vmem [thread:$0]  %s1489_s4, 2048, %s69_s23, [#allocation8], %s1253_s15, %s1253_s15, %s1254_s16  }
  0x65   :  { %s1222_s12 = scalar_lea.hbm %s1491_s6, 2048 }
  0x66   :  { %p1223_p6 = scmp.ne.s32.totalorder %s1491_s6, %s1222_s12  ;;  %p1226_p7 = scmp.lt.u32.totalorder %s1222_s12, %s1491_s6 }
  0x68   :  { %p1228_p8 = pnand %p1226_p7, %p1223_p6 }
  0x6a   :  { %1231 = shalt.err (!%p1228_p8)
}
  0x6b   :  { %s1232_s19 = scalar_lea.vmem %s93_s26, 2048  ;;  %p1237_p10 = scmp.lt.s32.totalorder %s93_s26, %s93_s26 }
  0x6c   :  { %p1233_p9 = scmp.ne.s32.totalorder %s93_s26, %s1232_s19  ;;  %p1238_p11 = scmp.lt.s32.totalorder %s1232_s19, %s1232_s19 }
  0x6e   :  { %p1239_p12 = por %p1238_p11, %p1237_p10 }
  0x70   :  { %p1240_p13 = pnand %p1239_p12, %p1233_p9 }
  0x72   :  { %1243 = shalt.err (!%p1240_p13)
}
  0x73   :  { %98 = dma.hbm_to_vmem [thread:$0]  %s1491_s6, 2048, %s93_s26, [#allocation11], %s1253_s15, %s1253_s15, %s1254_s16  }
  0x74   :  { %1244 = dma.done.wait [#allocation3], 128  }
  0x75   :  { %1245 = vsyncadd [#allocation3], 4294967168 }
  0x76   :  { %1246 = dma.done.wait [#allocation5], 2304  }
  0x77   :  { %1247 = vsyncadd [#allocation5], 4294964992 }
  0x78   :  { %1248 = dma.done.wait [#allocation8], 4096  }
  0x79   :  { %1249 = vsyncadd [#allocation8], 4294963200 }
  0x7a   :  { %1250 = dma.done.wait [#allocation11], 4096  }
  0x7b   :  { %1251 = vsyncadd [#allocation11], 4294963200  ;;  %v1261_v0 = vmov 0.0|0.0   ;;  %vm1262_vm0 = vmmov 0   ;;  %v1263_v1 = vmov 0.0   ;;  %v123_v2 = vld [vmem:[#allocation4] sm:$0xff] }
  0x7c   :  { %955 = vmatprep.subr.bf16.mxu0 %v1261_v0  ;;  %777 = vmatprep.mubr.msk.f32.mxu0 %vm1262_vm0, %v1263_v1  ;;  %v124_v3 = vld [vmem:[#allocation4 + $0x8] sm:$0xff]  ;;  %v206_v5 = vld [vmem:[#allocation6] sm:$0xff]  ;;  %v207_v6 = vld [vmem:[#allocation6 + $0x8] sm:$0xff]  ;;  %vm130_vm1 = vcmask 130048  }
  0x7d   :  { %958 = vmatprep.subr.bf16.mxu1 %v1261_v0  ;;  %812 = vmatprep.mubr.msk.f32.mxu1 %vm1262_vm0, %v1263_v1  ;;  %v956_v4 = vpack.c.bf16 %v124_v3, %v123_v2  ;;  %v208_v7 = vld [vmem:[#allocation6 + $0x10] sm:$0xff]  ;;  %v959_v8 = vpack.c.bf16 %v207_v6, %v206_v5  ;;  %v209_v9 = vld [vmem:[#allocation6 + $0x18] sm:$0xff]  ;;  %v122_v10 = vld [vmem:[#allocation2] sm:$0xff] }
  0x7e   :  { %v962_v11 = vpack.c.bf16 %v209_v9, %v208_v7  ;;  %v210_v12 = vld [vmem:[#allocation6 + $0x20] sm:$0xff]  ;;  %v211_v13 = vld [vmem:[#allocation6 + $0x28] sm:$0xff]  ;;  %v212_v15 = vld [vmem:[#allocation6 + $0x30] sm:$0xff] }
  0x7f   :  { %957 = vmatpush3.bf16.msra.mxu0 %v956_v4  ;;  %960 = vmatpush3.bf16.msra.mxu1 %v959_v8  ;;  %v965_v14 = vpack.c.bf16 %v211_v13, %v210_v12  ;;  %v213_v16 = vld [vmem:[#allocation6 + $0x38] sm:$0xff]  ;;  %v214_v18 = vld [vmem:[#allocation6 + $0x40] sm:$0xff]  ;;  %v215_v19 = vld [vmem:[#allocation6 + $0x48] sm:$0xff] }
  0x80   :  { %982 = vmatprep.subr.bf16.mxu0 %v1261_v0  ;;  %961 = vmatprep.subr.bf16.mxu1 %v1261_v0  ;;  %v968_v17 = vpack.c.bf16 %v213_v16, %v212_v15  ;;  %v971_v20 = vpack.c.bf16 %v215_v19, %v214_v18  ;;  %v216_v21 = vld [vmem:[#allocation6 + $0x50] sm:$0xff]  ;;  %v217_v22 = vld [vmem:[#allocation6 + $0x58] sm:$0xff]  ;;  %v218_v24 = vld [vmem:[#allocation6 + $0x60] sm:$0xff] }
  0x81   :  { %v974_v23 = vpack.c.bf16 %v217_v22, %v216_v21  ;;  %v219_v25 = vld [vmem:[#allocation6 + $0x68] sm:$0xff]  ;;  %v220_v27 = vld [vmem:[#allocation6 + $0x70] sm:$0xff]  ;;  %v221_v28 = vld [vmem:[#allocation6 + $0x78] sm:$0xff] }
  0x82   :  { %778 = vmatmul.mubr.msk.f32.vlgmr.msra.gmra.mrb[0].mxu0 %vm130_vm1, %v122_v10  ;;  %v977_v26 = vpack.c.bf16 %v219_v25, %v218_v24  ;;  %v980_v29 = vpack.c.bf16 %v221_v28, %v220_v27  ;;  %v299_v30 = vld [vmem:[#allocation7] sm:$0xff]  ;;  %v300_v31 = vld [vmem:[#allocation7 + $0x8] sm:$0xff]  ;;  %v301_v32 = vld [vmem:[#allocation7 + $0x10] sm:$0xff] }
  0x83   :  { %847 = vmatprep.mubr.msk.f32.mxu0 %vm1262_vm0, %v1263_v1  ;;  %963 = vmatpush3.bf16.msra.mxu1 %v962_v11  ;;  %v983_v33 = vpack.c.bf16 %v300_v31, %v299_v30  ;;  %v302_v34 = vld [vmem:[#allocation7 + $0x18] sm:$0xff]  ;;  %v303_v36 = vld [vmem:[#allocation7 + $0x20] sm:$0xff]  ;;  %v304_v37 = vld [vmem:[#allocation7 + $0x28] sm:$0xff] }
  0x84   :  { %964 = vmatprep.subr.bf16.mxu1 %v1261_v0  ;;  %v986_v35 = vpack.c.bf16 %v302_v34, %v301_v32  ;;  %v989_v38 = vpack.c.bf16 %v304_v37, %v303_v36  ;;  %v305_v39 = vld [vmem:[#allocation7 + $0x30] sm:$0xff]  ;;  %v306_v40 = vld [vmem:[#allocation7 + $0x38] sm:$0xff]  ;;  %v307_v42 = vld [vmem:[#allocation7 + $0x40] sm:$0xff] }
  0x85   :  { %984 = vmatpush3.bf16.msra.mxu0 %v983_v33  ;;  %v992_v41 = vpack.c.bf16 %v306_v40, %v305_v39  ;;  %v308_v43 = vld [vmem:[#allocation7 + $0x48] sm:$0xff]  ;;  %v309_v45 = vld [vmem:[#allocation7 + $0x50] sm:$0xff]  ;;  %v310_v46 = vld [vmem:[#allocation7 + $0x58] sm:$0xff] }
  0x86   :  { %985 = vmatprep.subr.bf16.mxu0 %v1261_v0  ;;  %v995_v44 = vpack.c.bf16 %v308_v43, %v307_v42  ;;  %v998_v47 = vpack.c.bf16 %v310_v46, %v309_v45  ;;  %v678_v48 = vld [vmem:[%s1492_s7] ss:$0 sm:$0xff]  ;;  %v311_v54 = vld [vmem:[#allocation7 + $0x60] sm:$0xff]  ;;  %v313_v57 = vld [vmem:[#allocation7 + $0x70] sm:$0xff] }
  0x87   :  { %966 = vmatpush3.bf16.msra.mxu1 %v965_v14  ;;  %v312_v55 = vld [vmem:[#allocation7 + $0x68] sm:$0xff]  ;;  %v314_v58 = vld [vmem:[#allocation7 + $0x78] sm:$0xff]  ;;  %v392_v60 = vld [vmem:[#allocation9] sm:$0xff] }
  0x88   :  { %967 = vmatprep.subr.bf16.mxu1 %v1261_v0  ;;  %v1001_v56 = vpack.c.bf16 %v312_v55, %v311_v54  ;;  %v1004_v59 = vpack.c.bf16 %v314_v58, %v313_v57  ;;  %v393_v61 = vld [vmem:[#allocation9 + $0x8] sm:$0xff]  ;;  %v394_v62 = vld [vmem:[#allocation9 + $0x10] sm:$0xff]  ;;  %v395_v2 = vld [vmem:[#allocation9 + $0x18] sm:$0xff] }
  0x89   :  { %987 = vmatpush3.bf16.msra.mxu0 %v986_v35  ;;  %v1007_v63 = vpack.c.bf16 %v393_v61, %v392_v60  ;;  %v1010_v3 = vpack.c.bf16 %v395_v2, %v394_v62  ;;  %v396_v4 = vld [vmem:[#allocation9 + $0x20] sm:$0xff]  ;;  %v397_v5 = vld [vmem:[#allocation9 + $0x28] sm:$0xff]  ;;  %v398_v7 = vld [vmem:[#allocation9 + $0x30] sm:$0xff] }
  0x8a   :  { %988 = vmatprep.subr.bf16.mxu0 %v1261_v0  ;;  %v1013_v6 = vpack.c.bf16 %v397_v5, %v396_v4  ;;  %v399_v8 = vld [vmem:[#allocation9 + $0x38] sm:$0xff]  ;;  %v400_v10 = vld [vmem:[#allocation9 + $0x40] sm:$0xff]  ;;  %v401_v11 = vld [vmem:[#allocation9 + $0x48] sm:$0xff] }
  0x8b   :  { %969 = vmatpush3.bf16.msra.mxu1 %v968_v17  ;;  %v1016_v9 = vpack.c.bf16 %v399_v8, %v398_v7  ;;  %v1019_v12 = vpack.c.bf16 %v401_v11, %v400_v10  ;;  %v402_v13 = vld [vmem:[#allocation9 + $0x50] sm:$0xff]  ;;  %v403_v14 = vld [vmem:[#allocation9 + $0x58] sm:$0xff]  ;;  %v680_v16 = vld [vmem:[%s1492_s7 + $0x1] ss:$0 sm:$0xff] }
  0x8c   :  { %970 = vmatprep.subr.bf16.mxu1 %v1261_v0  ;;  %v1022_v15 = vpack.c.bf16 %v403_v14, %v402_v13  ;;  %v404_v22 = vld [vmem:[#allocation9 + $0x60] sm:$0xff]  ;;  %v406_v25 = vld [vmem:[#allocation9 + $0x70] sm:$0xff]  ;;  %v488_v32 = vld [vmem:[#allocation10 + $0x18] sm:$0xff] }
  0x8d   :  { %990 = vmatpush3.bf16.msra.mxu0 %v989_v38  ;;  %v485_v28 = vld [vmem:[#allocation10] sm:$0xff]  ;;  %v487_v30 = vld [vmem:[#allocation10 + $0x10] sm:$0xff]  ;;  %v490_v35 = vld [vmem:[#allocation10 + $0x28] sm:$0xff] }
  0x8e   :  { %991 = vmatprep.subr.bf16.mxu0 %v1261_v0  ;;  %v1034_v33 = vpack.c.bf16 %v488_v32, %v487_v30  ;;  %v489_v34 = vld [vmem:[#allocation10 + $0x20] sm:$0xff]  ;;  %v491_v37 = vld [vmem:[#allocation10 + $0x30] sm:$0xff]  ;;  %v492_v38 = vld [vmem:[#allocation10 + $0x38] sm:$0xff] }
  0x8f   :  { %972 = vmatpush3.bf16.msra.mxu1 %v971_v20  ;;  %v1037_v36 = vpack.c.bf16 %v490_v35, %v489_v34  ;;  %v1040_v39 = vpack.c.bf16 %v492_v38, %v491_v37  ;;  %v493_v40 = vld [vmem:[#allocation10 + $0x40] sm:$0xff]  ;;  %v495_v43 = vld [vmem:[#allocation10 + $0x50] sm:$0xff]  ;;  %v681_v46 = vld [vmem:[%s1492_s7 + $0x2] ss:$0 sm:$0xff] }
  0x90   :  { %973 = vmatprep.subr.bf16.mxu1 %v1261_v0  ;;  %v499_v55 = vld [vmem:[#allocation10 + $0x70] sm:$0xff]  ;;  %v578_v58 = vld [vmem:[#allocation12] sm:$0xff]  ;;  %v581_v62 = vld [vmem:[#allocation12 + $0x18] sm:$0xff] }
  0x91   :  { %993 = vmatpush3.bf16.msra.mxu0 %v992_v41  ;;  %v494_v41 = vld [vmem:[#allocation10 + $0x48] sm:$0xff]  ;;  %v580_v60 = vld [vmem:[#allocation12 + $0x10] sm:$0xff]  ;;  %v585_v5 = vld [vmem:[#allocation12 + $0x38] sm:$0xff] }
  0x92   :  { %994 = vmatprep.subr.bf16.mxu0 %v1261_v0  ;;  %v1043_v42 = vpack.c.bf16 %v494_v41, %v493_v40  ;;  %v583_v2 = vld [vmem:[#allocation12 + $0x28] sm:$0xff]  ;;  %v584_v4 = vld [vmem:[#allocation12 + $0x30] sm:$0xff]  ;;  %v586_v7 = vld [vmem:[#allocation12 + $0x40] sm:$0xff] }
  0x93   :  { %975 = vmatpush3.bf16.msra.mxu1 %v974_v23  ;;  %v405_v23 = vld [vmem:[#allocation9 + $0x68] sm:$0xff]  ;;  %v588_v10 = vld [vmem:[#allocation12 + $0x50] sm:$0xff]  ;;  %v589_v11 = vld [vmem:[#allocation12 + $0x58] sm:$0xff] }
  0x94   :  { %976 = vmatprep.subr.bf16.mxu1 %v1261_v0  ;;  %v1025_v24 = vpack.c.bf16 %v405_v23, %v404_v22  ;;  %v587_v8 = vld [vmem:[#allocation12 + $0x48] sm:$0xff]  ;;  %v592_v22 = vld [vmem:[#allocation12 + $0x70] sm:$0xff]  ;;  %v593_v23 = vld [vmem:[#allocation12 + $0x78] sm:$0xff] }
  0x95   :  { %996 = vmatpush3.bf16.msra.mxu0 %v995_v44  ;;  %v496_v44 = vld [vmem:[#allocation10 + $0x58] sm:$0xff]  ;;  %v682_v13 = vld [vmem:[%s1492_s7 + $0x3] ss:$0 sm:$0xff] }
  0x96   :  { %997 = vmatprep.subr.bf16.mxu0 %v1261_v0  ;;  %v1046_v45 = vpack.c.bf16 %v496_v44, %v495_v43 }
  0x97   :  { %978 = vmatpush3.bf16.msra.mxu1 %v977_v26  ;;  %v407_v26 = vld [vmem:[#allocation9 + $0x78] sm:$0xff] }
  0x98   :  { %979 = vmatprep.subr.bf16.mxu1 %v1261_v0  ;;  %v1028_v27 = vpack.c.bf16 %v407_v26, %v406_v25  ;;  %v683_v25 = vld [vmem:[%s1492_s7 + $0x4] ss:$0 sm:$0xff] }
  0x99   :  { %999 = vmatpush3.bf16.msra.mxu0 %v998_v47 }
  0x9a   :  { %1000 = vmatprep.subr.bf16.mxu0 %v1261_v0 }
  0x9b   :  { %981 = vmatpush3.bf16.msra.mxu1 %v980_v29  ;;  %v486_v29 = vld [vmem:[#allocation10 + $0x8] sm:$0xff] }
  0x9c   :  { %1006 = vmatprep.subr.bf16.mxu1 %v1261_v0  ;;  %v1031_v31 = vpack.c.bf16 %v486_v29, %v485_v28 }
  0x9d   :  { %1002 = vmatpush3.bf16.msra.mxu0 %v1001_v56  ;;  %v500_v56 = vld [vmem:[#allocation10 + $0x78] sm:$0xff] }
  0x9e   :  { %1003 = vmatprep.subr.bf16.mxu0 %v1261_v0  ;;  %v1052_v57 = vpack.c.bf16 %v500_v56, %v499_v55 }
  0xa1   :  { %1005 = vmatpush3.bf16.msra.mxu0 %v1004_v59  ;;  %v579_v59 = vld [vmem:[#allocation12 + $0x8] sm:$0xff] }
  0xa2   :  { %1030 = vmatprep.subr.bf16.mxu0 %v1261_v0  ;;  %v1055_v61 = vpack.c.bf16 %v579_v59, %v578_v58 }
 0x155   :  { %v200_v49 = vpop.f32.mrb[0].mxu0 }
 0x156   :  { %v201_v50 = vadd.f32 %v678_v48, %v200_v49  ;;  %v779_v51 = vpop.f32.mrb[1].mxu0 }
 0x158   :  { %v204_v52 = vmul.f32 0.01, %v201_v50 }
 0x15a   :  { %v205_v53 = vmax.f32 %v201_v50, %v204_v52  ;;  %v497_v52 = vld [vmem:[#allocation10 + $0x60] sm:$0xff] }
 0x15c   :  { %813 = vmatmul.mubr.f32.vlgmr.msra.gmra.mrb[0].mxu1 %v205_v53  ;;  %v498_v53 = vld [vmem:[#allocation10 + $0x68] sm:$0xff] }
 0x15d   :  { %882 = vmatprep.mubr.msk.f32.mxu1 %vm1262_vm0, %v1263_v1  ;;  %1008 = vmatpush3.bf16.msra.mxu1 %v1007_v63  ;;  %v1049_v54 = vpack.c.bf16 %v498_v53, %v497_v52  ;;  %v1058_v63 = vpack.c.bf16 %v581_v62, %v580_v60 }
 0x15e   :  { %1009 = vmatprep.subr.bf16.mxu1 %v1261_v0 }
 0x161   :  { %1011 = vmatpush3.bf16.msra.mxu1 %v1010_v3 }
 0x162   :  { %1012 = vmatprep.subr.bf16.mxu1 %v1261_v0 }
 0x165   :  { %1014 = vmatpush3.bf16.msra.mxu1 %v1013_v6  ;;  %v1064_v6 = vpack.c.bf16 %v585_v5, %v584_v4 }
 0x166   :  { %1015 = vmatprep.subr.bf16.mxu1 %v1261_v0 }
 0x169   :  { %1017 = vmatpush3.bf16.msra.mxu1 %v1016_v9  ;;  %v1067_v9 = vpack.c.bf16 %v587_v8, %v586_v7 }
 0x16a   :  { %1018 = vmatprep.subr.bf16.mxu1 %v1261_v0 }
 0x16d   :  { %1020 = vmatpush3.bf16.msra.mxu1 %v1019_v12  ;;  %v1070_v12 = vpack.c.bf16 %v589_v11, %v588_v10 }
 0x16e   :  { %1021 = vmatprep.subr.bf16.mxu1 %v1261_v0 }
 0x171   :  { %1023 = vmatpush3.bf16.msra.mxu1 %v1022_v15 }
 0x172   :  { %1024 = vmatprep.subr.bf16.mxu1 %v1261_v0 }
 0x175   :  { %1026 = vmatpush3.bf16.msra.mxu1 %v1025_v24  ;;  %v1076_v24 = vpack.c.bf16 %v593_v23, %v592_v22 }
 0x176   :  { %1027 = vmatprep.subr.bf16.mxu1 %v1261_v0 }
 0x179   :  { %1029 = vmatpush3.bf16.msra.mxu1 %v1028_v27 }
 0x17a   :  { %1054 = vmatprep.subr.bf16.mxu1 %v1261_v0 }
 0x22f   :  { %v293_v17 = vpop.f32.mrb[0].mxu1 }
 0x230   :  { %v294_v18 = vadd.f32 %v680_v16, %v293_v17  ;;  %v814_v19 = vpop.f32.mrb[1].mxu1 }
 0x231   :  { %v590_v19 = vld [vmem:[#allocation12 + $0x60] sm:$0xff] }
 0x232   :  { %v297_v20 = vmul.f32 0.01, %v294_v18 }
 0x234   :  { %v298_v21 = vmax.f32 %v294_v18, %v297_v20  ;;  %v591_v20 = vld [vmem:[#allocation12 + $0x68] sm:$0xff] }
 0x236   :  { %848 = vmatmul.mubr.f32.vlgmr.msra.gmra.mrb[2].mxu0 %v298_v21  ;;  %v1073_v21 = vpack.c.bf16 %v591_v20, %v590_v19 }
 0x237   :  { %917 = vmatprep.mubr.msk.f32.mxu0 %vm1262_vm0, %v1263_v1  ;;  %1032 = vmatpush3.bf16.msra.mxu0 %v1031_v31  ;;  %v684_v31 = vld [vmem:[%s1492_s7 + $0x5] ss:$0 sm:$0xff] }
 0x238   :  { %1033 = vmatprep.subr.bf16.mxu0 %v1261_v0 }
 0x23b   :  { %1035 = vmatpush3.bf16.msra.mxu0 %v1034_v33 }
 0x23c   :  { %1036 = vmatprep.subr.bf16.mxu0 %v1261_v0 }
 0x23f   :  { %1038 = vmatpush3.bf16.msra.mxu0 %v1037_v36 }
 0x240   :  { %1039 = vmatprep.subr.bf16.mxu0 %v1261_v0 }
 0x243   :  { %1041 = vmatpush3.bf16.msra.mxu0 %v1040_v39 }
 0x244   :  { %1042 = vmatprep.subr.bf16.mxu0 %v1261_v0 }
 0x247   :  { %1044 = vmatpush3.bf16.msra.mxu0 %v1043_v42 }
 0x248   :  { %1045 = vmatprep.subr.bf16.mxu0 %v1261_v0 }
 0x24b   :  { %1047 = vmatpush3.bf16.msra.mxu0 %v1046_v45 }
 0x24c   :  { %1048 = vmatprep.subr.bf16.mxu0 %v1261_v0 }
 0x24f   :  { %1050 = vmatpush3.bf16.msra.mxu0 %v1049_v54 }
 0x250   :  { %1051 = vmatprep.subr.bf16.mxu0 %v1261_v0 }
 0x253   :  { %1053 = vmatpush3.bf16.msra.mxu0 %v1052_v57 }
 0x309   :  { %v386_v47 = vpop.f32.mrb[2].mxu0 }
 0x30a   :  { %v387_v48 = vadd.f32 %v681_v46, %v386_v47  ;;  %v849_v49 = vpop.f32.mrb[3].mxu0 }
 0x30c   :  { %v390_v50 = vmul.f32 0.01, %v387_v48 }
 0x30e   :  { %v391_v51 = vmax.f32 %v387_v48, %v390_v50 }
 0x310   :  { %883 = vmatmul.mubr.f32.vlgmr.msra.gmra.mrb[2].mxu1 %v391_v51 }
 0x311   :  { %952 = vmatprep.mubr.msk.f32.mxu1 %vm1262_vm0, %v1263_v1  ;;  %1056 = vmatpush3.bf16.msra.mxu1 %v1055_v61  ;;  %v582_v1 = vld [vmem:[#allocation12 + $0x20] sm:$0xff] }
 0x312   :  { %1057 = vmatprep.subr.bf16.mxu1 %v1261_v0  ;;  %v1061_v3 = vpack.c.bf16 %v583_v2, %v582_v1 }
 0x315   :  { %1059 = vmatpush3.bf16.msra.mxu1 %v1058_v63 }
 0x316   :  { %1060 = vmatprep.subr.bf16.mxu1 %v1261_v0 }
 0x319   :  { %1062 = vmatpush3.bf16.msra.mxu1 %v1061_v3 }
 0x31a   :  { %1063 = vmatprep.subr.bf16.mxu1 %v1261_v0 }
 0x31d   :  { %1065 = vmatpush3.bf16.msra.mxu1 %v1064_v6 }
 0x31e   :  { %1066 = vmatprep.subr.bf16.mxu1 %v1261_v0 }
 0x321   :  { %1068 = vmatpush3.bf16.msra.mxu1 %v1067_v9 }
 0x322   :  { %1069 = vmatprep.subr.bf16.mxu1 %v1261_v0 }
 0x325   :  { %1071 = vmatpush3.bf16.msra.mxu1 %v1070_v12 }
 0x326   :  { %1072 = vmatprep.subr.bf16.mxu1 %v1261_v0 }
 0x329   :  { %1074 = vmatpush3.bf16.msra.mxu1 %v1073_v21 }
 0x32a   :  { %1075 = vmatprep.subr.bf16.mxu1 %v1261_v0 }
 0x32d   :  { %1077 = vmatpush3.bf16.msra.mxu1 %v1076_v24 }
 0x3e3   :  { %v479_v14 = vpop.f32.mrb[2].mxu1 }
 0x3e4   :  { %v480_v15 = vadd.f32 %v682_v13, %v479_v14  ;;  %v884_v16 = vpop.f32.mrb[3].mxu1 }
 0x3e6   :  { %v483_v17 = vmul.f32 0.01, %v480_v15 }
 0x3e8   :  { %v484_v18 = vmax.f32 %v480_v15, %v483_v17 }
 0x3ea   :  { %918 = vmatmul.mubr.f32.vlgmr.msra.gmra.mrb[4].mxu0 %v484_v18 }
 0x4bd   :  { %v572_v26 = vpop.f32.mrb[4].mxu0 }
 0x4be   :  { %v573_v27 = vadd.f32 %v683_v25, %v572_v26  ;;  %v919_v28 = vpop.f32.mrb[5].mxu0 }
 0x4c0   :  { %v576_v29 = vmul.f32 0.01, %v573_v27 }
 0x4c2   :  { %v577_v30 = vmax.f32 %v573_v27, %v576_v29 }
 0x4c4   :  { %953 = vmatmul.mubr.f32.vlgmr.msra.gmra.mrb[4].mxu1 %v577_v30 }
 0x597   :  { %v665_v32 = vpop.f32.mrb[4].mxu1 }
 0x598   :  { %v666_v0 = vadd.f32 %v684_v31, %v665_v32  ;;  %v954_v33 = vpop.f32.mrb[5].mxu1 }
 0x59a   :  { %669 = vst [vmem:[%s1493_s8] sm:$0xff] %v666_v0 }
 0x59b   :  { %674 = vsyncpa [#allocation3], 1 }
 0x59c   :  { %675 = vsyncpa [#allocation5], 1 }
 0x59d   :  { %676 = vsyncpa [#allocation8], 1 }
 0x59e   :  { %677 = vsyncpa [#allocation11], 1 }

</bundles_post_ra>
